<compile_context>
chip_gen: v5e
topology: v5e:2x2
jax: 0.10.0
libtpu: 0.0.40
codegen_flags: <defaults>
</compile_context>

<pallas_src>
import numpy as np
import jax
import jax.numpy as jnp
from jax.experimental import pallas as pl
from jax.experimental.pallas import tpu as pltpu

# ----------------------------- configuration --------------------------------
B, T, F = 2, 8, 4                 # batch, d_time, d_feature
D_MODEL, D_FFN = 32, 64
N_HEADS, D_K, D_V = 2, 16, 16
N_LAYERS = 2
LN_EPS = 1e-6
ORT_WEIGHT = 1.0
MIT_WEIGHT = 1.0
BT = B * T


# ------------------------------ kernel helpers -------------------------------
def _layernorm(x, g, b):
    mu = jnp.mean(x, axis=-1, keepdims=True)
    xc = x - mu
    var = jnp.mean(xc * xc, axis=-1, keepdims=True)
    inv = jax.lax.rsqrt(var + LN_EPS)
    return xc * inv * g + b


def _dot(a, b):
    return jnp.dot(a, b, preferred_element_type=jnp.float32)


# ------------------------- single fused forward kernel -----------------------
def fused_forward_kernel(x_ref, m_ref, xori_ref, imask_ref,
                         embw_ref, embb_ref, pe_ref,
                         wq_ref, wk_ref, wv_ref, wfc_ref,
                         w1_ref, b1_ref, w2_ref, vec_ref,
                         redw_ref, redb_ref,
                         imp_ref, rep_ref, loss_ref):
    X = x_ref[...]                                     # (BT, F)
    M = m_ref[...]                                     # (BT, F)

    # embedding of concat([X, masks]) + positional encoding (dropout = identity)
    embw = embw_ref[...]                               # (2F, D_MODEL)
    h = (_dot(X, embw[:F, :]) + _dot(M, embw[F:, :])
         + embb_ref[...] + pe_ref[...])                # (BT, D_MODEL)

    inv_temp = jnp.float32(1.0 / (D_K ** 0.5))

    for l in range(N_LAYERS):                          # static layer loop
        wq, wk, wv, wfc = wq_ref[l], wk_ref[l], wv_ref[l], wfc_ref[l]
        w1, b1, w2 = w1_ref[l], b1_ref[l], w2_ref[l]
        vec = vec_ref[l]                               # (5, D_MODEL)
        ln1_g, ln1_b = vec[0:1, :], vec[1:2, :]
        b2 = vec[2:3, :]
        ln2_g, ln2_b = vec[3:4, :], vec[4:5, :]

        # projections over the whole folded batch (M = B*T rows)
        q = _dot(h, wq)                                # (BT, H*dk)
        k = _dot(h, wk)
        v = _dot(h, wv)

        # per-(batch, head) attention with static slices
        batch_ctx = []
        for b in range(B):
            r0 = b * T
            head_ctx = []
            for hd in range(N_HEADS):
                qh = q[r0:r0 + T, hd * D_K:(hd + 1) * D_K]
                kh = k[r0:r0 + T, hd * D_K:(hd + 1) * D_K]
                vh = v[r0:r0 + T, hd * D_V:(hd + 1) * D_V]
                s = _dot(qh, kh.T) * inv_temp          # (T, T)
                s = s - jnp.max(s, axis=-1, keepdims=True)
                e = jnp.exp(s)
                p = e * pl.reciprocal(jnp.sum(e, axis=-1, keepdims=True),
                                      approx=True)
                head_ctx.append(_dot(p, vh))           # (T, dv)
            batch_ctx.append(jnp.concatenate(head_ctx, axis=1))   # (T, H*dv)
        ctx = jnp.concatenate(batch_ctx, axis=0)       # (BT, H*dv)

        attn_out = _dot(ctx, wfc)                      # single output projection
        y = _layernorm(attn_out + h, ln1_g, ln1_b)

        f1 = jnp.maximum(_dot(y, w1) + b1, 0.0)
        f2 = _dot(f1, w2) + b2
        h = _layernorm(f2 + y, ln2_g, ln2_b)

    # reduce_dim + imputation mixing
    rep = _dot(h, redw_ref[...]) + redb_ref[...]       # (BT, F)
    rep_ref[...] = rep
    imp_ref[...] = M * X + (1.0 - M) * rep

    # ORT / MIT masked-MAE losses while rep is still in VMEM
    ort = jnp.sum(jnp.abs(rep - X) * M) / (jnp.sum(M) + 1e-12)
    xo = xori_ref[...]
    im = imask_ref[...]
    mit = jnp.sum(jnp.abs(rep - xo) * im) / (jnp.sum(im) + 1e-12)
    loss_ref[0] = ort
    loss_ref[1] = mit


# --------------------------------- wrapper ------------------------------------
def _full(shape):
    n = len(shape)
    return pl.BlockSpec(shape, lambda *_: (0,) * n)


def transformer_encoder_forward(params, pe_tiled, inputs, training=True):
    X = inputs['X'].reshape(BT, F)
    masks = inputs['missing_mask'].reshape(BT, F)
    X_ori = inputs['X_ori'].reshape(BT, F)
    ind = inputs['indicating_mask'].reshape(BT, F)

    operands = (X, masks, X_ori, ind,
                params['emb_w'], params['emb_b'], pe_tiled,
                params['wq'], params['wk'], params['wv'], params['wfc'],
                params['w1'], params['b1'], params['w2'], params['vec'],
                params['red_w'], params['red_b'])

    in_specs = [_full(tuple(op.shape)) for op in operands]

    imputed, rep, losses = pl.pallas_call(
        fused_forward_kernel,
        out_shape=(jax.ShapeDtypeStruct((BT, F), jnp.float32),
                   jax.ShapeDtypeStruct((BT, F), jnp.float32),
                   jax.ShapeDtypeStruct((2,), jnp.float32)),
        in_specs=in_specs,
        out_specs=(_full((BT, F)),
                   _full((BT, F)),
                   pl.BlockSpec(memory_space=pltpu.MemorySpace.SMEM)),
    )(*operands)

    imputed = imputed.reshape(B, T, F)
    rep = rep.reshape(B, T, F)

    results = {'imputed_data': imputed}
    if training:
        ort, mit = losses[0], losses[1]
        results['ORT_loss'] = ort
        results['MIT_loss'] = mit
        results['loss'] = ORT_WEIGHT * ort + MIT_WEIGHT * mit
    return results, rep


# --------------------------- parameters & buffers -----------------------------
def sinusoid_pe(n_pos, d_hid):
    pos = np.arange(n_pos)[:, None].astype(np.float64)
    hid = np.arange(d_hid)[None, :]
    angle = pos / np.power(10000.0, 2.0 * (hid // 2) / d_hid)
    table = np.zeros((n_pos, d_hid), np.float32)
    table[:, 0::2] = np.sin(angle[:, 0::2])
    table[:, 1::2] = np.cos(angle[:, 1::2])
    return jnp.asarray(table)


def init_params(key):
    keys = jax.random.split(key, 2 + N_LAYERS)

    def dense(k, fan_in, shape):
        return (jax.random.normal(k, shape, jnp.float32) / np.sqrt(fan_in)).astype(jnp.float32)

    wq, wk, wv, wfc, w1, w2 = [], [], [], [], [], []
    for l in range(N_LAYERS):
        lk = jax.random.split(keys[2 + l], 6)
        wq.append(dense(lk[0], D_MODEL, (D_MODEL, N_HEADS * D_K)))
        wk.append(dense(lk[1], D_MODEL, (D_MODEL, N_HEADS * D_K)))
        wv.append(dense(lk[2], D_MODEL, (D_MODEL, N_HEADS * D_V)))
        wfc.append(dense(lk[3], N_HEADS * D_V, (N_HEADS * D_V, D_MODEL)))
        w1.append(dense(lk[4], D_MODEL, (D_MODEL, D_FFN)))
        w2.append(dense(lk[5], D_FFN, (D_FFN, D_MODEL)))

    ones = jnp.ones((N_LAYERS, 1, D_MODEL), jnp.float32)
    zeros = jnp.zeros((N_LAYERS, 1, D_MODEL), jnp.float32)
    # packed per-layer vectors: [ln1_gamma, ln1_beta, ffn_b2, ln2_gamma, ln2_beta]
    vec = jnp.concatenate([ones, zeros, zeros, ones, zeros], axis=1)

    return {
        'emb_w': dense(keys[0], 2 * F, (2 * F, D_MODEL)),
        'emb_b': jnp.zeros((1, D_MODEL), jnp.float32),
        'red_w': dense(keys[1], D_MODEL, (D_MODEL, F)),
        'red_b': jnp.zeros((1, F), jnp.float32),
        'wq': jnp.stack(wq), 'wk': jnp.stack(wk), 'wv': jnp.stack(wv),
        'wfc': jnp.stack(wfc),
        'w1': jnp.stack(w1),
        'b1': jnp.zeros((N_LAYERS, 1, D_FFN), jnp.float32),
        'w2': jnp.stack(w2),
        'vec': vec,
    }


# ------------------------------ pure-JAX reference ----------------------------
def _ln_ref(x, g, b):
    mu = jnp.mean(x, axis=-1, keepdims=True)
    var = jnp.mean((x - mu) ** 2, axis=-1, keepdims=True)
    return (x - mu) * jax.lax.rsqrt(var + LN_EPS) * g + b


def _ref_forward(params, pe, inputs):
    with jax.default_matmul_precision('float32'):
        X, masks = inputs['X'], inputs['missing_mask']
        h = jnp.concatenate([X, masks], axis=2) @ params['emb_w'] + params['emb_b']
        h = h + pe[None, :, :]
        for l in range(N_LAYERS):
            vec = params['vec'][l]
            ln1_g, ln1_b, b2, ln2_g, ln2_b = vec[0], vec[1], vec[2], vec[3], vec[4]
            q = (h @ params['wq'][l]).reshape(B, T, N_HEADS, D_K).transpose(0, 2, 1, 3)
            k = (h @ params['wk'][l]).reshape(B, T, N_HEADS, D_K).transpose(0, 2, 1, 3)
            v = (h @ params['wv'][l]).reshape(B, T, N_HEADS, D_V).transpose(0, 2, 1, 3)
            scores = jnp.einsum('bhqd,bhkd->bhqk', q, k) / np.sqrt(D_K)
            attn = jax.nn.softmax(scores, axis=-1)
            ctx = jnp.einsum('bhqk,bhkd->bhqd', attn, v)
            ctx = ctx.transpose(0, 2, 1, 3).reshape(B, T, N_HEADS * D_V)
            y = _ln_ref(ctx @ params['wfc'][l] + h, ln1_g, ln1_b)
            f = jnp.maximum(y @ params['w1'][l] + params['b1'][l], 0.0) @ params['w2'][l] + b2
            h = _ln_ref(f + y, ln2_g, ln2_b)
        rep = h @ params['red_w'] + params['red_b']
        imputed = masks * X + (1 - masks) * rep
        ort = jnp.sum(jnp.abs(rep - X) * masks) / (jnp.sum(masks) + 1e-12)
        mit = (jnp.sum(jnp.abs(rep - inputs['X_ori']) * inputs['indicating_mask'])
               / (jnp.sum(inputs['indicating_mask']) + 1e-12))
        return imputed, ort + mit


# ----------------------------------- main -------------------------------------
if __name__ == "__main__":
    key = jax.random.PRNGKey(0)
    k_x, k_xo, k_m, k_im, k_p = jax.random.split(key, 5)

    X_ori = jax.random.normal(k_xo, (B, T, F), jnp.float32)
    missing_mask = jax.random.bernoulli(k_m, 0.7, (B, T, F)).astype(jnp.float32)
    indicating_mask = jax.random.bernoulli(k_im, 0.2, (B, T, F)).astype(jnp.float32)
    X = X_ori * missing_mask                       # observed values only

    inputs = {'X': X, 'missing_mask': missing_mask,
              'X_ori': X_ori, 'indicating_mask': indicating_mask}

    params = init_params(k_p)
    pe = sinusoid_pe(T, D_MODEL)
    pe_tiled = jnp.tile(pe, (B, 1))                # (B*T, D_MODEL), computed once

    results, rep = transformer_encoder_forward(params, pe_tiled, inputs, training=True)
    jax.block_until_ready(results['imputed_data'])
    jax.block_until_ready(results['loss'])

    # sanity check against a pure-JAX reference (approx reciprocal -> 2e-3 tol)
    ref_imputed, ref_loss = _ref_forward(params, pe, inputs)
    np.testing.assert_allclose(np.asarray(results['imputed_data']),
                               np.asarray(ref_imputed), rtol=2e-3, atol=2e-3)
    np.testing.assert_allclose(float(results['loss']), float(ref_loss),
                               rtol=2e-3, atol=2e-3)

    print("KERNEL_OK")
</pallas_src>

<mosaic_0001>
module attributes {stable_mosaic.version = 11 : i64} {
  func.func @fused_forward_kernel(%arg0: memref<16x4xf32, #tpu.memory_space<vmem>>, %arg1: memref<16x4xf32, #tpu.memory_space<vmem>>, %arg2: memref<16x4xf32, #tpu.memory_space<vmem>>, %arg3: memref<16x4xf32, #tpu.memory_space<vmem>>, %arg4: memref<8x32xf32, #tpu.memory_space<vmem>>, %arg5: memref<1x32xf32, #tpu.memory_space<vmem>>, %arg6: memref<16x32xf32, #tpu.memory_space<vmem>>, %arg7: memref<2x32x32xf32, #tpu.memory_space<vmem>>, %arg8: memref<2x32x32xf32, #tpu.memory_space<vmem>>, %arg9: memref<2x32x32xf32, #tpu.memory_space<vmem>>, %arg10: memref<2x32x32xf32, #tpu.memory_space<vmem>>, %arg11: memref<2x32x64xf32, #tpu.memory_space<vmem>>, %arg12: memref<2x1x64xf32, #tpu.memory_space<vmem>>, %arg13: memref<2x64x32xf32, #tpu.memory_space<vmem>>, %arg14: memref<2x5x32xf32, #tpu.memory_space<vmem>>, %arg15: memref<32x4xf32, #tpu.memory_space<vmem>>, %arg16: memref<1x4xf32, #tpu.memory_space<vmem>>, %arg17: memref<16x4xf32, #tpu.memory_space<vmem>>, %arg18: memref<16x4xf32, #tpu.memory_space<vmem>>, %arg19: memref<2xf32, #tpu.memory_space<smem>>) attributes {dimension_semantics = [], scalar_prefetch = 0 : i64, scratch_operands = 0 : i64, tpu.core_type = #tpu.core_type<tc>} {
    %c0 = arith.constant 0 : index
    %c0_0 = arith.constant 0 : index
    %0 = vector.load %arg0[%c0, %c0_0] : memref<16x4xf32, #tpu.memory_space<vmem>>, vector<16x4xf32>
    %c0_1 = arith.constant 0 : index
    %c0_2 = arith.constant 0 : index
    %1 = vector.load %arg1[%c0_1, %c0_2] : memref<16x4xf32, #tpu.memory_space<vmem>>, vector<16x4xf32>
    %c0_3 = arith.constant 0 : index
    %c0_4 = arith.constant 0 : index
    %2 = vector.load %arg4[%c0_3, %c0_4] : memref<8x32xf32, #tpu.memory_space<vmem>>, vector<8x32xf32>
    %3 = vector.extract_strided_slice %2 {offsets = [0, 0], sizes = [4, 32], strides = [1, 1]} : vector<8x32xf32> to vector<4x32xf32>
    %cst = arith.constant dense<0.000000e+00> : vector<16x32xf32>
    %4 = tpu.matmul %0, %3, %cst {dimension_numbers = #tpu.dot_dimension_numbers<[1], [0], [0], [1], [0, 0, 1, 1], [], []>} : vector<16x4xf32>, vector<4x32xf32>, vector<16x32xf32> -> vector<16x32xf32>
    %5 = vector.extract_strided_slice %2 {offsets = [4, 0], sizes = [4, 32], strides = [1, 1]} : vector<8x32xf32> to vector<4x32xf32>
    %cst_5 = arith.constant dense<0.000000e+00> : vector<16x32xf32>
    %6 = tpu.matmul %1, %5, %cst_5 {dimension_numbers = #tpu.dot_dimension_numbers<[1], [0], [0], [1], [0, 0, 1, 1], [], []>} : vector<16x4xf32>, vector<4x32xf32>, vector<16x32xf32> -> vector<16x32xf32>
    %7 = arith.addf %4, %6 : vector<16x32xf32>
    %c0_6 = arith.constant 0 : index
    %c0_7 = arith.constant 0 : index
    %8 = vector.load %arg5[%c0_6, %c0_7] : memref<1x32xf32, #tpu.memory_space<vmem>>, vector<1x32xf32>
    %9 = vector.broadcast %8 : vector<1x32xf32> to vector<16x32xf32>
    %10 = arith.addf %7, %9 : vector<16x32xf32>
    %c0_8 = arith.constant 0 : index
    %c0_9 = arith.constant 0 : index
    %11 = vector.load %arg6[%c0_8, %c0_9] : memref<16x32xf32, #tpu.memory_space<vmem>>, vector<16x32xf32>
    %12 = arith.addf %10, %11 : vector<16x32xf32>
    %c0_10 = arith.constant 0 : index
    %c0_11 = arith.constant 0 : index
    %c0_12 = arith.constant 0 : index
    %13 = vector.load %arg7[%c0_10, %c0_11, %c0_12] : memref<2x32x32xf32, #tpu.memory_space<vmem>>, vector<1x32x32xf32>
    %14 = vector.shape_cast %13 : vector<1x32x32xf32> to vector<32x32xf32>
    %c0_13 = arith.constant 0 : index
    %c0_14 = arith.constant 0 : index
    %c0_15 = arith.constant 0 : index
    %15 = vector.load %arg8[%c0_13, %c0_14, %c0_15] : memref<2x32x32xf32, #tpu.memory_space<vmem>>, vector<1x32x32xf32>
    %16 = vector.shape_cast %15 : vector<1x32x32xf32> to vector<32x32xf32>
    %c0_16 = arith.constant 0 : index
    %c0_17 = arith.constant 0 : index
    %c0_18 = arith.constant 0 : index
    %17 = vector.load %arg9[%c0_16, %c0_17, %c0_18] : memref<2x32x32xf32, #tpu.memory_space<vmem>>, vector<1x32x32xf32>
    %18 = vector.shape_cast %17 : vector<1x32x32xf32> to vector<32x32xf32>
    %c0_19 = arith.constant 0 : index
    %c0_20 = arith.constant 0 : index
    %c0_21 = arith.constant 0 : index
    %19 = vector.load %arg10[%c0_19, %c0_20, %c0_21] : memref<2x32x32xf32, #tpu.memory_space<vmem>>, vector<1x32x32xf32>
    %20 = vector.shape_cast %19 : vector<1x32x32xf32> to vector<32x32xf32>
    %c0_22 = arith.constant 0 : index
    %c0_23 = arith.constant 0 : index
    %c0_24 = arith.constant 0 : index
    %21 = vector.load %arg11[%c0_22, %c0_23, %c0_24] : memref<2x32x64xf32, #tpu.memory_space<vmem>>, vector<1x32x64xf32>
    %22 = vector.shape_cast %21 : vector<1x32x64xf32> to vector<32x64xf32>
    %c0_25 = arith.constant 0 : index
    %c0_26 = arith.constant 0 : index
    %c0_27 = arith.constant 0 : index
    %23 = vector.load %arg12[%c0_25, %c0_26, %c0_27] : memref<2x1x64xf32, #tpu.memory_space<vmem>>, vector<1x1x64xf32>
    %24 = vector.shape_cast %23 : vector<1x1x64xf32> to vector<1x64xf32>
    %c0_28 = arith.constant 0 : index
    %c0_29 = arith.constant 0 : index
    %c0_30 = arith.constant 0 : index
    %25 = vector.load %arg13[%c0_28, %c0_29, %c0_30] : memref<2x64x32xf32, #tpu.memory_space<vmem>>, vector<1x64x32xf32>
    %26 = vector.shape_cast %25 : vector<1x64x32xf32> to vector<64x32xf32>
    %c0_31 = arith.constant 0 : index
    %c0_32 = arith.constant 0 : index
    %c0_33 = arith.constant 0 : index
    %27 = vector.load %arg14[%c0_31, %c0_32, %c0_33] : memref<2x5x32xf32, #tpu.memory_space<vmem>>, vector<1x5x32xf32>
    %28 = vector.shape_cast %27 : vector<1x5x32xf32> to vector<5x32xf32>
    %29 = vector.extract_strided_slice %28 {offsets = [0, 0], sizes = [1, 32], strides = [1, 1]} : vector<5x32xf32> to vector<1x32xf32>
    %30 = vector.extract_strided_slice %28 {offsets = [1, 0], sizes = [1, 32], strides = [1, 1]} : vector<5x32xf32> to vector<1x32xf32>
    %31 = vector.extract_strided_slice %28 {offsets = [2, 0], sizes = [1, 32], strides = [1, 1]} : vector<5x32xf32> to vector<1x32xf32>
    %32 = vector.extract_strided_slice %28 {offsets = [3, 0], sizes = [1, 32], strides = [1, 1]} : vector<5x32xf32> to vector<1x32xf32>
    %33 = vector.extract_strided_slice %28 {offsets = [4, 0], sizes = [1, 32], strides = [1, 1]} : vector<5x32xf32> to vector<1x32xf32>
    %cst_34 = arith.constant dense<0.000000e+00> : vector<16x32xf32>
    %34 = tpu.matmul %12, %14, %cst_34 {dimension_numbers = #tpu.dot_dimension_numbers<[1], [0], [0], [1], [0, 0, 1, 1], [], []>} : vector<16x32xf32>, vector<32x32xf32>, vector<16x32xf32> -> vector<16x32xf32>
    %cst_35 = arith.constant dense<0.000000e+00> : vector<16x32xf32>
    %35 = tpu.matmul %12, %16, %cst_35 {dimension_numbers = #tpu.dot_dimension_numbers<[1], [0], [0], [1], [0, 0, 1, 1], [], []>} : vector<16x32xf32>, vector<32x32xf32>, vector<16x32xf32> -> vector<16x32xf32>
    %cst_36 = arith.constant dense<0.000000e+00> : vector<16x32xf32>
    %36 = tpu.matmul %12, %18, %cst_36 {dimension_numbers = #tpu.dot_dimension_numbers<[1], [0], [0], [1], [0, 0, 1, 1], [], []>} : vector<16x32xf32>, vector<32x32xf32>, vector<16x32xf32> -> vector<16x32xf32>
    %37 = vector.extract_strided_slice %34 {offsets = [0, 0], sizes = [8, 16], strides = [1, 1]} : vector<16x32xf32> to vector<8x16xf32>
    %38 = vector.extract_strided_slice %35 {offsets = [0, 0], sizes = [8, 16], strides = [1, 1]} : vector<16x32xf32> to vector<8x16xf32>
    %39 = vector.extract_strided_slice %36 {offsets = [0, 0], sizes = [8, 16], strides = [1, 1]} : vector<16x32xf32> to vector<8x16xf32>
    %40 = tpu.transpose %38, [1, 0] : vector<8x16xf32> -> vector<16x8xf32>
    %cst_37 = arith.constant dense<0.000000e+00> : vector<8x8xf32>
    %41 = tpu.matmul %37, %40, %cst_37 {dimension_numbers = #tpu.dot_dimension_numbers<[1], [0], [0], [1], [0, 0, 1, 1], [], []>} : vector<8x16xf32>, vector<16x8xf32>, vector<8x8xf32> -> vector<8x8xf32>
    %cst_38 = arith.constant 2.500000e-01 : f32
    %42 = vector.broadcast %cst_38 : f32 to vector<8x8xf32>
    %43 = arith.mulf %41, %42 : vector<8x8xf32>
    %cst_39 = arith.constant dense<0xFF800000> : vector<8xf32>
    %44 = vector.multi_reduction <maximumf>, %43, %cst_39 [1] : vector<8x8xf32> to vector<8xf32>
    %45 = vector.shape_cast %44 : vector<8xf32> to vector<8x1xf32>
    %46 = vector.broadcast %45 : vector<8x1xf32> to vector<8x8xf32>
    %47 = arith.subf %43, %46 : vector<8x8xf32>
    %48 = math.exp %47 : vector<8x8xf32>
    %cst_40 = arith.constant dense<0.000000e+00> : vector<8xf32>
    %49 = vector.multi_reduction <add>, %48, %cst_40 [1] : vector<8x8xf32> to vector<8xf32>
    %50 = vector.shape_cast %49 : vector<8xf32> to vector<8x1xf32>
    %51 = tpu.reciprocal %50 {approx = true} : vector<8x1xf32> -> vector<8x1xf32>
    %52 = vector.broadcast %51 : vector<8x1xf32> to vector<8x8xf32>
    %53 = arith.mulf %48, %52 : vector<8x8xf32>
    %cst_41 = arith.constant dense<0.000000e+00> : vector<8x16xf32>
    %54 = tpu.matmul %53, %39, %cst_41 {dimension_numbers = #tpu.dot_dimension_numbers<[1], [0], [0], [1], [0, 0, 1, 1], [], []>} : vector<8x8xf32>, vector<8x16xf32>, vector<8x16xf32> -> vector<8x16xf32>
    %55 = vector.extract_strided_slice %34 {offsets = [0, 16], sizes = [8, 16], strides = [1, 1]} : vector<16x32xf32> to vector<8x16xf32>
    %56 = vector.extract_strided_slice %35 {offsets = [0, 16], sizes = [8, 16], strides = [1, 1]} : vector<16x32xf32> to vector<8x16xf32>
    %57 = vector.extract_strided_slice %36 {offsets = [0, 16], sizes = [8, 16], strides = [1, 1]} : vector<16x32xf32> to vector<8x16xf32>
    %58 = tpu.transpose %56, [1, 0] : vector<8x16xf32> -> vector<16x8xf32>
    %cst_42 = arith.constant dense<0.000000e+00> : vector<8x8xf32>
    %59 = tpu.matmul %55, %58, %cst_42 {dimension_numbers = #tpu.dot_dimension_numbers<[1], [0], [0], [1], [0, 0, 1, 1], [], []>} : vector<8x16xf32>, vector<16x8xf32>, vector<8x8xf32> -> vector<8x8xf32>
    %cst_43 = arith.constant 2.500000e-01 : f32
    %60 = vector.broadcast %cst_43 : f32 to vector<8x8xf32>
    %61 = arith.mulf %59, %60 : vector<8x8xf32>
    %cst_44 = arith.constant dense<0xFF800000> : vector<8xf32>
    %62 = vector.multi_reduction <maximumf>, %61, %cst_44 [1] : vector<8x8xf32> to vector<8xf32>
    %63 = vector.shape_cast %62 : vector<8xf32> to vector<8x1xf32>
    %64 = vector.broadcast %63 : vector<8x1xf32> to vector<8x8xf32>
    %65 = arith.subf %61, %64 : vector<8x8xf32>
    %66 = math.exp %65 : vector<8x8xf32>
    %cst_45 = arith.constant dense<0.000000e+00> : vector<8xf32>
    %67 = vector.multi_reduction <add>, %66, %cst_45 [1] : vector<8x8xf32> to vector<8xf32>
    %68 = vector.shape_cast %67 : vector<8xf32> to vector<8x1xf32>
    %69 = tpu.reciprocal %68 {approx = true} : vector<8x1xf32> -> vector<8x1xf32>
    %70 = vector.broadcast %69 : vector<8x1xf32> to vector<8x8xf32>
    %71 = arith.mulf %66, %70 : vector<8x8xf32>
    %cst_46 = arith.constant dense<0.000000e+00> : vector<8x16xf32>
    %72 = tpu.matmul %71, %57, %cst_46 {dimension_numbers = #tpu.dot_dimension_numbers<[1], [0], [0], [1], [0, 0, 1, 1], [], []>} : vector<8x8xf32>, vector<8x16xf32>, vector<8x16xf32> -> vector<8x16xf32>
    %73 = tpu.concatenate %54, %72 in 1 : vector<8x16xf32>, vector<8x16xf32> -> vector<8x32xf32>
    %74 = vector.extract_strided_slice %34 {offsets = [8, 0], sizes = [8, 16], strides = [1, 1]} : vector<16x32xf32> to vector<8x16xf32>
    %75 = vector.extract_strided_slice %35 {offsets = [8, 0], sizes = [8, 16], strides = [1, 1]} : vector<16x32xf32> to vector<8x16xf32>
    %76 = vector.extract_strided_slice %36 {offsets = [8, 0], sizes = [8, 16], strides = [1, 1]} : vector<16x32xf32> to vector<8x16xf32>
    %77 = tpu.transpose %75, [1, 0] : vector<8x16xf32> -> vector<16x8xf32>
    %cst_47 = arith.constant dense<0.000000e+00> : vector<8x8xf32>
    %78 = tpu.matmul %74, %77, %cst_47 {dimension_numbers = #tpu.dot_dimension_numbers<[1], [0], [0], [1], [0, 0, 1, 1], [], []>} : vector<8x16xf32>, vector<16x8xf32>, vector<8x8xf32> -> vector<8x8xf32>
    %cst_48 = arith.constant 2.500000e-01 : f32
    %79 = vector.broadcast %cst_48 : f32 to vector<8x8xf32>
    %80 = arith.mulf %78, %79 : vector<8x8xf32>
    %cst_49 = arith.constant dense<0xFF800000> : vector<8xf32>
    %81 = vector.multi_reduction <maximumf>, %80, %cst_49 [1] : vector<8x8xf32> to vector<8xf32>
    %82 = vector.shape_cast %81 : vector<8xf32> to vector<8x1xf32>
    %83 = vector.broadcast %82 : vector<8x1xf32> to vector<8x8xf32>
    %84 = arith.subf %80, %83 : vector<8x8xf32>
    %85 = math.exp %84 : vector<8x8xf32>
    %cst_50 = arith.constant dense<0.000000e+00> : vector<8xf32>
    %86 = vector.multi_reduction <add>, %85, %cst_50 [1] : vector<8x8xf32> to vector<8xf32>
    %87 = vector.shape_cast %86 : vector<8xf32> to vector<8x1xf32>
    %88 = tpu.reciprocal %87 {approx = true} : vector<8x1xf32> -> vector<8x1xf32>
    %89 = vector.broadcast %88 : vector<8x1xf32> to vector<8x8xf32>
    %90 = arith.mulf %85, %89 : vector<8x8xf32>
    %cst_51 = arith.constant dense<0.000000e+00> : vector<8x16xf32>
    %91 = tpu.matmul %90, %76, %cst_51 {dimension_numbers = #tpu.dot_dimension_numbers<[1], [0], [0], [1], [0, 0, 1, 1], [], []>} : vector<8x8xf32>, vector<8x16xf32>, vector<8x16xf32> -> vector<8x16xf32>
    %92 = vector.extract_strided_slice %34 {offsets = [8, 16], sizes = [8, 16], strides = [1, 1]} : vector<16x32xf32> to vector<8x16xf32>
    %93 = vector.extract_strided_slice %35 {offsets = [8, 16], sizes = [8, 16], strides = [1, 1]} : vector<16x32xf32> to vector<8x16xf32>
    %94 = vector.extract_strided_slice %36 {offsets = [8, 16], sizes = [8, 16], strides = [1, 1]} : vector<16x32xf32> to vector<8x16xf32>
    %95 = tpu.transpose %93, [1, 0] : vector<8x16xf32> -> vector<16x8xf32>
    %cst_52 = arith.constant dense<0.000000e+00> : vector<8x8xf32>
    %96 = tpu.matmul %92, %95, %cst_52 {dimension_numbers = #tpu.dot_dimension_numbers<[1], [0], [0], [1], [0, 0, 1, 1], [], []>} : vector<8x16xf32>, vector<16x8xf32>, vector<8x8xf32> -> vector<8x8xf32>
    %cst_53 = arith.constant 2.500000e-01 : f32
    %97 = vector.broadcast %cst_53 : f32 to vector<8x8xf32>
    %98 = arith.mulf %96, %97 : vector<8x8xf32>
    %cst_54 = arith.constant dense<0xFF800000> : vector<8xf32>
    %99 = vector.multi_reduction <maximumf>, %98, %cst_54 [1] : vector<8x8xf32> to vector<8xf32>
    %100 = vector.shape_cast %99 : vector<8xf32> to vector<8x1xf32>
    %101 = vector.broadcast %100 : vector<8x1xf32> to vector<8x8xf32>
    %102 = arith.subf %98, %101 : vector<8x8xf32>
    %103 = math.exp %102 : vector<8x8xf32>
    %cst_55 = arith.constant dense<0.000000e+00> : vector<8xf32>
    %104 = vector.multi_reduction <add>, %103, %cst_55 [1] : vector<8x8xf32> to vector<8xf32>
    %105 = vector.shape_cast %104 : vector<8xf32> to vector<8x1xf32>
    %106 = tpu.reciprocal %105 {approx = true} : vector<8x1xf32> -> vector<8x1xf32>
    %107 = vector.broadcast %106 : vector<8x1xf32> to vector<8x8xf32>
    %108 = arith.mulf %103, %107 : vector<8x8xf32>
    %cst_56 = arith.constant dense<0.000000e+00> : vector<8x16xf32>
    %109 = tpu.matmul %108, %94, %cst_56 {dimension_numbers = #tpu.dot_dimension_numbers<[1], [0], [0], [1], [0, 0, 1, 1], [], []>} : vector<8x8xf32>, vector<8x16xf32>, vector<8x16xf32> -> vector<8x16xf32>
    %110 = tpu.concatenate %91, %109 in 1 : vector<8x16xf32>, vector<8x16xf32> -> vector<8x32xf32>
    %111 = tpu.concatenate %73, %110 in 0 : vector<8x32xf32>, vector<8x32xf32> -> vector<16x32xf32>
    %cst_57 = arith.constant dense<0.000000e+00> : vector<16x32xf32>
    %112 = tpu.matmul %111, %20, %cst_57 {dimension_numbers = #tpu.dot_dimension_numbers<[1], [0], [0], [1], [0, 0, 1, 1], [], []>} : vector<16x32xf32>, vector<32x32xf32>, vector<16x32xf32> -> vector<16x32xf32>
    %113 = arith.addf %112, %12 : vector<16x32xf32>
    %cst_58 = arith.constant dense<0.000000e+00> : vector<16xf32>
    %114 = vector.multi_reduction <add>, %113, %cst_58 [1] : vector<16x32xf32> to vector<16xf32>
    %115 = vector.shape_cast %114 : vector<16xf32> to vector<16x1xf32>
    %cst_59 = arith.constant 3.200000e+01 : f32
    %116 = vector.broadcast %cst_59 : f32 to vector<16x1xf32>
    %117 = arith.divf %115, %116 : vector<16x1xf32>
    %118 = vector.broadcast %117 : vector<16x1xf32> to vector<16x32xf32>
    %119 = arith.subf %113, %118 : vector<16x32xf32>
    %120 = arith.mulf %119, %119 : vector<16x32xf32>
    %cst_60 = arith.constant dense<0.000000e+00> : vector<16xf32>
    %121 = vector.multi_reduction <add>, %120, %cst_60 [1] : vector<16x32xf32> to vector<16xf32>
    %122 = vector.shape_cast %121 : vector<16xf32> to vector<16x1xf32>
    %cst_61 = arith.constant 3.200000e+01 : f32
    %123 = vector.broadcast %cst_61 : f32 to vector<16x1xf32>
    %124 = arith.divf %122, %123 : vector<16x1xf32>
    %cst_62 = arith.constant 9.99999997E-7 : f32
    %125 = vector.broadcast %cst_62 : f32 to vector<16x1xf32>
    %126 = arith.addf %124, %125 : vector<16x1xf32>
    %127 = math.rsqrt %126 : vector<16x1xf32>
    %128 = vector.broadcast %127 : vector<16x1xf32> to vector<16x32xf32>
    %129 = arith.mulf %119, %128 : vector<16x32xf32>
    %130 = vector.broadcast %29 : vector<1x32xf32> to vector<16x32xf32>
    %131 = arith.mulf %129, %130 : vector<16x32xf32>
    %132 = vector.broadcast %30 : vector<1x32xf32> to vector<16x32xf32>
    %133 = arith.addf %131, %132 : vector<16x32xf32>
    %cst_63 = arith.constant dense<0.000000e+00> : vector<16x64xf32>
    %134 = tpu.matmul %133, %22, %cst_63 {dimension_numbers = #tpu.dot_dimension_numbers<[1], [0], [0], [1], [0, 0, 1, 1], [], []>} : vector<16x32xf32>, vector<32x64xf32>, vector<16x64xf32> -> vector<16x64xf32>
    %135 = vector.broadcast %24 : vector<1x64xf32> to vector<16x64xf32>
    %136 = arith.addf %134, %135 : vector<16x64xf32>
    %cst_64 = arith.constant 0.000000e+00 : f32
    %137 = vector.broadcast %cst_64 : f32 to vector<16x64xf32>
    %138 = arith.maximumf %136, %137 : vector<16x64xf32>
    %cst_65 = arith.constant dense<0.000000e+00> : vector<16x32xf32>
    %139 = tpu.matmul %138, %26, %cst_65 {dimension_numbers = #tpu.dot_dimension_numbers<[1], [0], [0], [1], [0, 0, 1, 1], [], []>} : vector<16x64xf32>, vector<64x32xf32>, vector<16x32xf32> -> vector<16x32xf32>
    %140 = vector.broadcast %31 : vector<1x32xf32> to vector<16x32xf32>
    %141 = arith.addf %139, %140 : vector<16x32xf32>
    %142 = arith.addf %141, %133 : vector<16x32xf32>
    %cst_66 = arith.constant dense<0.000000e+00> : vector<16xf32>
    %143 = vector.multi_reduction <add>, %142, %cst_66 [1] : vector<16x32xf32> to vector<16xf32>
    %144 = vector.shape_cast %143 : vector<16xf32> to vector<16x1xf32>
    %cst_67 = arith.constant 3.200000e+01 : f32
    %145 = vector.broadcast %cst_67 : f32 to vector<16x1xf32>
    %146 = arith.divf %144, %145 : vector<16x1xf32>
    %147 = vector.broadcast %146 : vector<16x1xf32> to vector<16x32xf32>
    %148 = arith.subf %142, %147 : vector<16x32xf32>
    %149 = arith.mulf %148, %148 : vector<16x32xf32>
    %cst_68 = arith.constant dense<0.000000e+00> : vector<16xf32>
    %150 = vector.multi_reduction <add>, %149, %cst_68 [1] : vector<16x32xf32> to vector<16xf32>
    %151 = vector.shape_cast %150 : vector<16xf32> to vector<16x1xf32>
    %cst_69 = arith.constant 3.200000e+01 : f32
    %152 = vector.broadcast %cst_69 : f32 to vector<16x1xf32>
    %153 = arith.divf %151, %152 : vector<16x1xf32>
    %cst_70 = arith.constant 9.99999997E-7 : f32
    %154 = vector.broadcast %cst_70 : f32 to vector<16x1xf32>
    %155 = arith.addf %153, %154 : vector<16x1xf32>
    %156 = math.rsqrt %155 : vector<16x1xf32>
    %157 = vector.broadcast %156 : vector<16x1xf32> to vector<16x32xf32>
    %158 = arith.mulf %148, %157 : vector<16x32xf32>
    %159 = vector.broadcast %32 : vector<1x32xf32> to vector<16x32xf32>
    %160 = arith.mulf %158, %159 : vector<16x32xf32>
    %161 = vector.broadcast %33 : vector<1x32xf32> to vector<16x32xf32>
    %162 = arith.addf %160, %161 : vector<16x32xf32>
    %c1 = arith.constant 1 : index
    %c0_71 = arith.constant 0 : index
    %c0_72 = arith.constant 0 : index
    %163 = vector.load %arg7[%c1, %c0_71, %c0_72] : memref<2x32x32xf32, #tpu.memory_space<vmem>>, vector<1x32x32xf32>
    %164 = vector.shape_cast %163 : vector<1x32x32xf32> to vector<32x32xf32>
    %c1_73 = arith.constant 1 : index
    %c0_74 = arith.constant 0 : index
    %c0_75 = arith.constant 0 : index
    %165 = vector.load %arg8[%c1_73, %c0_74, %c0_75] : memref<2x32x32xf32, #tpu.memory_space<vmem>>, vector<1x32x32xf32>
    %166 = vector.shape_cast %165 : vector<1x32x32xf32> to vector<32x32xf32>
    %c1_76 = arith.constant 1 : index
    %c0_77 = arith.constant 0 : index
    %c0_78 = arith.constant 0 : index
    %167 = vector.load %arg9[%c1_76, %c0_77, %c0_78] : memref<2x32x32xf32, #tpu.memory_space<vmem>>, vector<1x32x32xf32>
    %168 = vector.shape_cast %167 : vector<1x32x32xf32> to vector<32x32xf32>
    %c1_79 = arith.constant 1 : index
    %c0_80 = arith.constant 0 : index
    %c0_81 = arith.constant 0 : index
    %169 = vector.load %arg10[%c1_79, %c0_80, %c0_81] : memref<2x32x32xf32, #tpu.memory_space<vmem>>, vector<1x32x32xf32>
    %170 = vector.shape_cast %169 : vector<1x32x32xf32> to vector<32x32xf32>
    %c1_82 = arith.constant 1 : index
    %c0_83 = arith.constant 0 : index
    %c0_84 = arith.constant 0 : index
    %171 = vector.load %arg11[%c1_82, %c0_83, %c0_84] : memref<2x32x64xf32, #tpu.memory_space<vmem>>, vector<1x32x64xf32>
    %172 = vector.shape_cast %171 : vector<1x32x64xf32> to vector<32x64xf32>
    %c1_85 = arith.constant 1 : index
    %c0_86 = arith.constant 0 : index
    %c0_87 = arith.constant 0 : index
    %173 = vector.load %arg12[%c1_85, %c0_86, %c0_87] : memref<2x1x64xf32, #tpu.memory_space<vmem>>, vector<1x1x64xf32>
    %174 = vector.shape_cast %173 : vector<1x1x64xf32> to vector<1x64xf32>
    %c1_88 = arith.constant 1 : index
    %c0_89 = arith.constant 0 : index
    %c0_90 = arith.constant 0 : index
    %175 = vector.load %arg13[%c1_88, %c0_89, %c0_90] : memref<2x64x32xf32, #tpu.memory_space<vmem>>, vector<1x64x32xf32>
    %176 = vector.shape_cast %175 : vector<1x64x32xf32> to vector<64x32xf32>
    %c1_91 = arith.constant 1 : index
    %c0_92 = arith.constant 0 : index
    %c0_93 = arith.constant 0 : index
    %177 = vector.load %arg14[%c1_91, %c0_92, %c0_93] : memref<2x5x32xf32, #tpu.memory_space<vmem>>, vector<1x5x32xf32>
    %178 = vector.shape_cast %177 : vector<1x5x32xf32> to vector<5x32xf32>
    %179 = vector.extract_strided_slice %178 {offsets = [0, 0], sizes = [1, 32], strides = [1, 1]} : vector<5x32xf32> to vector<1x32xf32>
    %180 = vector.extract_strided_slice %178 {offsets = [1, 0], sizes = [1, 32], strides = [1, 1]} : vector<5x32xf32> to vector<1x32xf32>
    %181 = vector.extract_strided_slice %178 {offsets = [2, 0], sizes = [1, 32], strides = [1, 1]} : vector<5x32xf32> to vector<1x32xf32>
    %182 = vector.extract_strided_slice %178 {offsets = [3, 0], sizes = [1, 32], strides = [1, 1]} : vector<5x32xf32> to vector<1x32xf32>
    %183 = vector.extract_strided_slice %178 {offsets = [4, 0], sizes = [1, 32], strides = [1, 1]} : vector<5x32xf32> to vector<1x32xf32>
    %cst_94 = arith.constant dense<0.000000e+00> : vector<16x32xf32>
    %184 = tpu.matmul %162, %164, %cst_94 {dimension_numbers = #tpu.dot_dimension_numbers<[1], [0], [0], [1], [0, 0, 1, 1], [], []>} : vector<16x32xf32>, vector<32x32xf32>, vector<16x32xf32> -> vector<16x32xf32>
    %cst_95 = arith.constant dense<0.000000e+00> : vector<16x32xf32>
    %185 = tpu.matmul %162, %166, %cst_95 {dimension_numbers = #tpu.dot_dimension_numbers<[1], [0], [0], [1], [0, 0, 1, 1], [], []>} : vector<16x32xf32>, vector<32x32xf32>, vector<16x32xf32> -> vector<16x32xf32>
    %cst_96 = arith.constant dense<0.000000e+00> : vector<16x32xf32>
    %186 = tpu.matmul %162, %168, %cst_96 {dimension_numbers = #tpu.dot_dimension_numbers<[1], [0], [0], [1], [0, 0, 1, 1], [], []>} : vector<16x32xf32>, vector<32x32xf32>, vector<16x32xf32> -> vector<16x32xf32>
    %187 = vector.extract_strided_slice %184 {offsets = [0, 0], sizes = [8, 16], strides = [1, 1]} : vector<16x32xf32> to vector<8x16xf32>
    %188 = vector.extract_strided_slice %185 {offsets = [0, 0], sizes = [8, 16], strides = [1, 1]} : vector<16x32xf32> to vector<8x16xf32>
    %189 = vector.extract_strided_slice %186 {offsets = [0, 0], sizes = [8, 16], strides = [1, 1]} : vector<16x32xf32> to vector<8x16xf32>
    %190 = tpu.transpose %188, [1, 0] : vector<8x16xf32> -> vector<16x8xf32>
    %cst_97 = arith.constant dense<0.000000e+00> : vector<8x8xf32>
    %191 = tpu.matmul %187, %190, %cst_97 {dimension_numbers = #tpu.dot_dimension_numbers<[1], [0], [0], [1], [0, 0, 1, 1], [], []>} : vector<8x16xf32>, vector<16x8xf32>, vector<8x8xf32> -> vector<8x8xf32>
    %cst_98 = arith.constant 2.500000e-01 : f32
    %192 = vector.broadcast %cst_98 : f32 to vector<8x8xf32>
    %193 = arith.mulf %191, %192 : vector<8x8xf32>
    %cst_99 = arith.constant dense<0xFF800000> : vector<8xf32>
    %194 = vector.multi_reduction <maximumf>, %193, %cst_99 [1] : vector<8x8xf32> to vector<8xf32>
    %195 = vector.shape_cast %194 : vector<8xf32> to vector<8x1xf32>
    %196 = vector.broadcast %195 : vector<8x1xf32> to vector<8x8xf32>
    %197 = arith.subf %193, %196 : vector<8x8xf32>
    %198 = math.exp %197 : vector<8x8xf32>
    %cst_100 = arith.constant dense<0.000000e+00> : vector<8xf32>
    %199 = vector.multi_reduction <add>, %198, %cst_100 [1] : vector<8x8xf32> to vector<8xf32>
    %200 = vector.shape_cast %199 : vector<8xf32> to vector<8x1xf32>
    %201 = tpu.reciprocal %200 {approx = true} : vector<8x1xf32> -> vector<8x1xf32>
    %202 = vector.broadcast %201 : vector<8x1xf32> to vector<8x8xf32>
    %203 = arith.mulf %198, %202 : vector<8x8xf32>
    %cst_101 = arith.constant dense<0.000000e+00> : vector<8x16xf32>
    %204 = tpu.matmul %203, %189, %cst_101 {dimension_numbers = #tpu.dot_dimension_numbers<[1], [0], [0], [1], [0, 0, 1, 1], [], []>} : vector<8x8xf32>, vector<8x16xf32>, vector<8x16xf32> -> vector<8x16xf32>
    %205 = vector.extract_strided_slice %184 {offsets = [0, 16], sizes = [8, 16], strides = [1, 1]} : vector<16x32xf32> to vector<8x16xf32>
    %206 = vector.extract_strided_slice %185 {offsets = [0, 16], sizes = [8, 16], strides = [1, 1]} : vector<16x32xf32> to vector<8x16xf32>
    %207 = vector.extract_strided_slice %186 {offsets = [0, 16], sizes = [8, 16], strides = [1, 1]} : vector<16x32xf32> to vector<8x16xf32>
    %208 = tpu.transpose %206, [1, 0] : vector<8x16xf32> -> vector<16x8xf32>
    %cst_102 = arith.constant dense<0.000000e+00> : vector<8x8xf32>
    %209 = tpu.matmul %205, %208, %cst_102 {dimension_numbers = #tpu.dot_dimension_numbers<[1], [0], [0], [1], [0, 0, 1, 1], [], []>} : vector<8x16xf32>, vector<16x8xf32>, vector<8x8xf32> -> vector<8x8xf32>
    %cst_103 = arith.constant 2.500000e-01 : f32
    %210 = vector.broadcast %cst_103 : f32 to vector<8x8xf32>
    %211 = arith.mulf %209, %210 : vector<8x8xf32>
    %cst_104 = arith.constant dense<0xFF800000> : vector<8xf32>
    %212 = vector.multi_reduction <maximumf>, %211, %cst_104 [1] : vector<8x8xf32> to vector<8xf32>
    %213 = vector.shape_cast %212 : vector<8xf32> to vector<8x1xf32>
    %214 = vector.broadcast %213 : vector<8x1xf32> to vector<8x8xf32>
    %215 = arith.subf %211, %214 : vector<8x8xf32>
    %216 = math.exp %215 : vector<8x8xf32>
    %cst_105 = arith.constant dense<0.000000e+00> : vector<8xf32>
    %217 = vector.multi_reduction <add>, %216, %cst_105 [1] : vector<8x8xf32> to vector<8xf32>
    %218 = vector.shape_cast %217 : vector<8xf32> to vector<8x1xf32>
    %219 = tpu.reciprocal %218 {approx = true} : vector<8x1xf32> -> vector<8x1xf32>
    %220 = vector.broadcast %219 : vector<8x1xf32> to vector<8x8xf32>
    %221 = arith.mulf %216, %220 : vector<8x8xf32>
    %cst_106 = arith.constant dense<0.000000e+00> : vector<8x16xf32>
    %222 = tpu.matmul %221, %207, %cst_106 {dimension_numbers = #tpu.dot_dimension_numbers<[1], [0], [0], [1], [0, 0, 1, 1], [], []>} : vector<8x8xf32>, vector<8x16xf32>, vector<8x16xf32> -> vector<8x16xf32>
    %223 = tpu.concatenate %204, %222 in 1 : vector<8x16xf32>, vector<8x16xf32> -> vector<8x32xf32>
    %224 = vector.extract_strided_slice %184 {offsets = [8, 0], sizes = [8, 16], strides = [1, 1]} : vector<16x32xf32> to vector<8x16xf32>
    %225 = vector.extract_strided_slice %185 {offsets = [8, 0], sizes = [8, 16], strides = [1, 1]} : vector<16x32xf32> to vector<8x16xf32>
    %226 = vector.extract_strided_slice %186 {offsets = [8, 0], sizes = [8, 16], strides = [1, 1]} : vector<16x32xf32> to vector<8x16xf32>
    %227 = tpu.transpose %225, [1, 0] : vector<8x16xf32> -> vector<16x8xf32>
    %cst_107 = arith.constant dense<0.000000e+00> : vector<8x8xf32>
    %228 = tpu.matmul %224, %227, %cst_107 {dimension_numbers = #tpu.dot_dimension_numbers<[1], [0], [0], [1], [0, 0, 1, 1], [], []>} : vector<8x16xf32>, vector<16x8xf32>, vector<8x8xf32> -> vector<8x8xf32>
    %cst_108 = arith.constant 2.500000e-01 : f32
    %229 = vector.broadcast %cst_108 : f32 to vector<8x8xf32>
    %230 = arith.mulf %228, %229 : vector<8x8xf32>
    %cst_109 = arith.constant dense<0xFF800000> : vector<8xf32>
    %231 = vector.multi_reduction <maximumf>, %230, %cst_109 [1] : vector<8x8xf32> to vector<8xf32>
    %232 = vector.shape_cast %231 : vector<8xf32> to vector<8x1xf32>
    %233 = vector.broadcast %232 : vector<8x1xf32> to vector<8x8xf32>
    %234 = arith.subf %230, %233 : vector<8x8xf32>
    %235 = math.exp %234 : vector<8x8xf32>
    %cst_110 = arith.constant dense<0.000000e+00> : vector<8xf32>
    %236 = vector.multi_reduction <add>, %235, %cst_110 [1] : vector<8x8xf32> to vector<8xf32>
    %237 = vector.shape_cast %236 : vector<8xf32> to vector<8x1xf32>
    %238 = tpu.reciprocal %237 {approx = true} : vector<8x1xf32> -> vector<8x1xf32>
    %239 = vector.broadcast %238 : vector<8x1xf32> to vector<8x8xf32>
    %240 = arith.mulf %235, %239 : vector<8x8xf32>
    %cst_111 = arith.constant dense<0.000000e+00> : vector<8x16xf32>
    %241 = tpu.matmul %240, %226, %cst_111 {dimension_numbers = #tpu.dot_dimension_numbers<[1], [0], [0], [1], [0, 0, 1, 1], [], []>} : vector<8x8xf32>, vector<8x16xf32>, vector<8x16xf32> -> vector<8x16xf32>
    %242 = vector.extract_strided_slice %184 {offsets = [8, 16], sizes = [8, 16], strides = [1, 1]} : vector<16x32xf32> to vector<8x16xf32>
    %243 = vector.extract_strided_slice %185 {offsets = [8, 16], sizes = [8, 16], strides = [1, 1]} : vector<16x32xf32> to vector<8x16xf32>
    %244 = vector.extract_strided_slice %186 {offsets = [8, 16], sizes = [8, 16], strides = [1, 1]} : vector<16x32xf32> to vector<8x16xf32>
    %245 = tpu.transpose %243, [1, 0] : vector<8x16xf32> -> vector<16x8xf32>
    %cst_112 = arith.constant dense<0.000000e+00> : vector<8x8xf32>
    %246 = tpu.matmul %242, %245, %cst_112 {dimension_numbers = #tpu.dot_dimension_numbers<[1], [0], [0], [1], [0, 0, 1, 1], [], []>} : vector<8x16xf32>, vector<16x8xf32>, vector<8x8xf32> -> vector<8x8xf32>
    %cst_113 = arith.constant 2.500000e-01 : f32
    %247 = vector.broadcast %cst_113 : f32 to vector<8x8xf32>
    %248 = arith.mulf %246, %247 : vector<8x8xf32>
    %cst_114 = arith.constant dense<0xFF800000> : vector<8xf32>
    %249 = vector.multi_reduction <maximumf>, %248, %cst_114 [1] : vector<8x8xf32> to vector<8xf32>
    %250 = vector.shape_cast %249 : vector<8xf32> to vector<8x1xf32>
    %251 = vector.broadcast %250 : vector<8x1xf32> to vector<8x8xf32>
    %252 = arith.subf %248, %251 : vector<8x8xf32>
    %253 = math.exp %252 : vector<8x8xf32>
    %cst_115 = arith.constant dense<0.000000e+00> : vector<8xf32>
    %254 = vector.multi_reduction <add>, %253, %cst_115 [1] : vector<8x8xf32> to vector<8xf32>
    %255 = vector.shape_cast %254 : vector<8xf32> to vector<8x1xf32>
    %256 = tpu.reciprocal %255 {approx = true} : vector<8x1xf32> -> vector<8x1xf32>
    %257 = vector.broadcast %256 : vector<8x1xf32> to vector<8x8xf32>
    %258 = arith.mulf %253, %257 : vector<8x8xf32>
    %cst_116 = arith.constant dense<0.000000e+00> : vector<8x16xf32>
    %259 = tpu.matmul %258, %244, %cst_116 {dimension_numbers = #tpu.dot_dimension_numbers<[1], [0], [0], [1], [0, 0, 1, 1], [], []>} : vector<8x8xf32>, vector<8x16xf32>, vector<8x16xf32> -> vector<8x16xf32>
    %260 = tpu.concatenate %241, %259 in 1 : vector<8x16xf32>, vector<8x16xf32> -> vector<8x32xf32>
    %261 = tpu.concatenate %223, %260 in 0 : vector<8x32xf32>, vector<8x32xf32> -> vector<16x32xf32>
    %cst_117 = arith.constant dense<0.000000e+00> : vector<16x32xf32>
    %262 = tpu.matmul %261, %170, %cst_117 {dimension_numbers = #tpu.dot_dimension_numbers<[1], [0], [0], [1], [0, 0, 1, 1], [], []>} : vector<16x32xf32>, vector<32x32xf32>, vector<16x32xf32> -> vector<16x32xf32>
    %263 = arith.addf %262, %162 : vector<16x32xf32>
    %cst_118 = arith.constant dense<0.000000e+00> : vector<16xf32>
    %264 = vector.multi_reduction <add>, %263, %cst_118 [1] : vector<16x32xf32> to vector<16xf32>
    %265 = vector.shape_cast %264 : vector<16xf32> to vector<16x1xf32>
    %cst_119 = arith.constant 3.200000e+01 : f32
    %266 = vector.broadcast %cst_119 : f32 to vector<16x1xf32>
    %267 = arith.divf %265, %266 : vector<16x1xf32>
    %268 = vector.broadcast %267 : vector<16x1xf32> to vector<16x32xf32>
    %269 = arith.subf %263, %268 : vector<16x32xf32>
    %270 = arith.mulf %269, %269 : vector<16x32xf32>
    %cst_120 = arith.constant dense<0.000000e+00> : vector<16xf32>
    %271 = vector.multi_reduction <add>, %270, %cst_120 [1] : vector<16x32xf32> to vector<16xf32>
    %272 = vector.shape_cast %271 : vector<16xf32> to vector<16x1xf32>
    %cst_121 = arith.constant 3.200000e+01 : f32
    %273 = vector.broadcast %cst_121 : f32 to vector<16x1xf32>
    %274 = arith.divf %272, %273 : vector<16x1xf32>
    %cst_122 = arith.constant 9.99999997E-7 : f32
    %275 = vector.broadcast %cst_122 : f32 to vector<16x1xf32>
    %276 = arith.addf %274, %275 : vector<16x1xf32>
    %277 = math.rsqrt %276 : vector<16x1xf32>
    %278 = vector.broadcast %277 : vector<16x1xf32> to vector<16x32xf32>
    %279 = arith.mulf %269, %278 : vector<16x32xf32>
    %280 = vector.broadcast %179 : vector<1x32xf32> to vector<16x32xf32>
    %281 = arith.mulf %279, %280 : vector<16x32xf32>
    %282 = vector.broadcast %180 : vector<1x32xf32> to vector<16x32xf32>
    %283 = arith.addf %281, %282 : vector<16x32xf32>
    %cst_123 = arith.constant dense<0.000000e+00> : vector<16x64xf32>
    %284 = tpu.matmul %283, %172, %cst_123 {dimension_numbers = #tpu.dot_dimension_numbers<[1], [0], [0], [1], [0, 0, 1, 1], [], []>} : vector<16x32xf32>, vector<32x64xf32>, vector<16x64xf32> -> vector<16x64xf32>
    %285 = vector.broadcast %174 : vector<1x64xf32> to vector<16x64xf32>
    %286 = arith.addf %284, %285 : vector<16x64xf32>
    %cst_124 = arith.constant 0.000000e+00 : f32
    %287 = vector.broadcast %cst_124 : f32 to vector<16x64xf32>
    %288 = arith.maximumf %286, %287 : vector<16x64xf32>
    %cst_125 = arith.constant dense<0.000000e+00> : vector<16x32xf32>
    %289 = tpu.matmul %288, %176, %cst_125 {dimension_numbers = #tpu.dot_dimension_numbers<[1], [0], [0], [1], [0, 0, 1, 1], [], []>} : vector<16x64xf32>, vector<64x32xf32>, vector<16x32xf32> -> vector<16x32xf32>
    %290 = vector.broadcast %181 : vector<1x32xf32> to vector<16x32xf32>
    %291 = arith.addf %289, %290 : vector<16x32xf32>
    %292 = arith.addf %291, %283 : vector<16x32xf32>
    %cst_126 = arith.constant dense<0.000000e+00> : vector<16xf32>
    %293 = vector.multi_reduction <add>, %292, %cst_126 [1] : vector<16x32xf32> to vector<16xf32>
    %294 = vector.shape_cast %293 : vector<16xf32> to vector<16x1xf32>
    %cst_127 = arith.constant 3.200000e+01 : f32
    %295 = vector.broadcast %cst_127 : f32 to vector<16x1xf32>
    %296 = arith.divf %294, %295 : vector<16x1xf32>
    %297 = vector.broadcast %296 : vector<16x1xf32> to vector<16x32xf32>
    %298 = arith.subf %292, %297 : vector<16x32xf32>
    %299 = arith.mulf %298, %298 : vector<16x32xf32>
    %cst_128 = arith.constant dense<0.000000e+00> : vector<16xf32>
    %300 = vector.multi_reduction <add>, %299, %cst_128 [1] : vector<16x32xf32> to vector<16xf32>
    %301 = vector.shape_cast %300 : vector<16xf32> to vector<16x1xf32>
    %cst_129 = arith.constant 3.200000e+01 : f32
    %302 = vector.broadcast %cst_129 : f32 to vector<16x1xf32>
    %303 = arith.divf %301, %302 : vector<16x1xf32>
    %cst_130 = arith.constant 9.99999997E-7 : f32
    %304 = vector.broadcast %cst_130 : f32 to vector<16x1xf32>
    %305 = arith.addf %303, %304 : vector<16x1xf32>
    %306 = math.rsqrt %305 : vector<16x1xf32>
    %307 = vector.broadcast %306 : vector<16x1xf32> to vector<16x32xf32>
    %308 = arith.mulf %298, %307 : vector<16x32xf32>
    %309 = vector.broadcast %182 : vector<1x32xf32> to vector<16x32xf32>
    %310 = arith.mulf %308, %309 : vector<16x32xf32>
    %311 = vector.broadcast %183 : vector<1x32xf32> to vector<16x32xf32>
    %312 = arith.addf %310, %311 : vector<16x32xf32>
    %c0_131 = arith.constant 0 : index
    %c0_132 = arith.constant 0 : index
    %313 = vector.load %arg15[%c0_131, %c0_132] : memref<32x4xf32, #tpu.memory_space<vmem>>, vector<32x4xf32>
    %cst_133 = arith.constant dense<0.000000e+00> : vector<16x4xf32>
    %314 = tpu.matmul %312, %313, %cst_133 {dimension_numbers = #tpu.dot_dimension_numbers<[1], [0], [0], [1], [0, 0, 1, 1], [], []>} : vector<16x32xf32>, vector<32x4xf32>, vector<16x4xf32> -> vector<16x4xf32>
    %c0_134 = arith.constant 0 : index
    %c0_135 = arith.constant 0 : index
    %315 = vector.load %arg16[%c0_134, %c0_135] : memref<1x4xf32, #tpu.memory_space<vmem>>, vector<1x4xf32>
    %316 = vector.broadcast %315 : vector<1x4xf32> to vector<16x4xf32>
    %317 = arith.addf %314, %316 : vector<16x4xf32>
    %c0_136 = arith.constant 0 : index
    %c0_137 = arith.constant 0 : index
    %318 = vector.load %arg18[%c0_136, %c0_137] : memref<16x4xf32, #tpu.memory_space<vmem>>, vector<16x4xf32>
    tpu.vector_store %arg18[%c0_136, %c0_137], %317 {strides = array<i32>} : memref<16x4xf32, #tpu.memory_space<vmem>>, vector<16x4xf32>,
    %319 = arith.mulf %1, %0 : vector<16x4xf32>
    %cst_138 = arith.constant 1.000000e+00 : f32
    %320 = vector.broadcast %cst_138 : f32 to vector<16x4xf32>
    %321 = arith.subf %320, %1 : vector<16x4xf32>
    %322 = arith.mulf %321, %317 : vector<16x4xf32>
    %323 = arith.addf %319, %322 : vector<16x4xf32>
    %c0_139 = arith.constant 0 : index
    %c0_140 = arith.constant 0 : index
    %324 = vector.load %arg17[%c0_139, %c0_140] : memref<16x4xf32, #tpu.memory_space<vmem>>, vector<16x4xf32>
    tpu.vector_store %arg17[%c0_139, %c0_140], %323 {strides = array<i32>} : memref<16x4xf32, #tpu.memory_space<vmem>>, vector<16x4xf32>,
    %325 = arith.subf %317, %0 : vector<16x4xf32>
    %326 = math.absf %325 : vector<16x4xf32>
    %327 = arith.mulf %326, %1 : vector<16x4xf32>
    %328 = vector.shape_cast %327 : vector<16x4xf32> to vector<1x16x4xf32>
    %cst_141 = arith.constant dense<0.000000e+00> : vector<1xf32>
    %329 = vector.multi_reduction <add>, %328, %cst_141 [1, 2] : vector<1x16x4xf32> to vector<1xf32>
    %330 = vector.shape_cast %329 : vector<1xf32> to vector<1x1x1xf32>
    %331 = vector.extract %330[0, 0, 0] : f32 from vector<1x1x1xf32>
    %332 = vector.shape_cast %1 : vector<16x4xf32> to vector<1x16x4xf32>
    %cst_142 = arith.constant dense<0.000000e+00> : vector<1xf32>
    %333 = vector.multi_reduction <add>, %332, %cst_142 [1, 2] : vector<1x16x4xf32> to vector<1xf32>
    %334 = vector.shape_cast %333 : vector<1xf32> to vector<1x1x1xf32>
    %335 = vector.extract %334[0, 0, 0] : f32 from vector<1x1x1xf32>
    %cst_143 = arith.constant 9.99999996E-13 : f32
    %336 = arith.addf %335, %cst_143 : f32
    %337 = arith.divf %331, %336 : f32
    %c0_144 = arith.constant 0 : index
    %c0_145 = arith.constant 0 : index
    %338 = vector.load %arg2[%c0_144, %c0_145] : memref<16x4xf32, #tpu.memory_space<vmem>>, vector<16x4xf32>
    %c0_146 = arith.constant 0 : index
    %c0_147 = arith.constant 0 : index
    %339 = vector.load %arg3[%c0_146, %c0_147] : memref<16x4xf32, #tpu.memory_space<vmem>>, vector<16x4xf32>
    %340 = arith.subf %317, %338 : vector<16x4xf32>
    %341 = math.absf %340 : vector<16x4xf32>
    %342 = arith.mulf %341, %339 : vector<16x4xf32>
    %343 = vector.shape_cast %342 : vector<16x4xf32> to vector<1x16x4xf32>
    %cst_148 = arith.constant dense<0.000000e+00> : vector<1xf32>
    %344 = vector.multi_reduction <add>, %343, %cst_148 [1, 2] : vector<1x16x4xf32> to vector<1xf32>
    %345 = vector.shape_cast %344 : vector<1xf32> to vector<1x1x1xf32>
    %346 = vector.extract %345[0, 0, 0] : f32 from vector<1x1x1xf32>
    %347 = vector.shape_cast %339 : vector<16x4xf32> to vector<1x16x4xf32>
    %cst_149 = arith.constant dense<0.000000e+00> : vector<1xf32>
    %348 = vector.multi_reduction <add>, %347, %cst_149 [1, 2] : vector<1x16x4xf32> to vector<1xf32>
    %349 = vector.shape_cast %348 : vector<1xf32> to vector<1x1x1xf32>
    %350 = vector.extract %349[0, 0, 0] : f32 from vector<1x1x1xf32>
    %cst_150 = arith.constant 9.99999996E-13 : f32
    %351 = arith.addf %350, %cst_150 : f32
    %352 = arith.divf %346, %351 : f32
    %c0_151 = arith.constant 0 : index
    %353 = memref.load %arg19[%c0_151] : memref<2xf32, #tpu.memory_space<smem>>
    memref.store %337, %arg19[%c0_151] : memref<2xf32, #tpu.memory_space<smem>>
    %c1_152 = arith.constant 1 : index
    %354 = memref.load %arg19[%c1_152] : memref<2xf32, #tpu.memory_space<smem>>
    memref.store %352, %arg19[%c1_152] : memref<2xf32, #tpu.memory_space<smem>>
    return
  }
}

</mosaic_0001>

<bundles_post_ra>
// kernel: tpu_custom_call.1
= control target key start
LH: loop header
LB: loop body
LE: loop exit
PB: predicated region body
PF: predicated region fallthrough
CT: control target
= control target key end

     0   :  { %s2243_s0 = inlined_call_operand.vmem [shape: f32[16,4], index: 0, kind: input, shape index: {}]   ;;  %s2244_s1 = inlined_call_operand.vmem [shape: f32[16,4], index: 1, kind: input, shape index: {}]   ;;  %s2245_s2 = inlined_call_operand.vmem [shape: f32[16,4], index: 2, kind: input, shape index: {}]   ;;  %s2246_s3 = inlined_call_operand.vmem [shape: f32[16,4], index: 3, kind: input, shape index: {}]   ;;  %s2247_s4 = inlined_call_operand.vmem [shape: f32[8,32], index: 4, kind: input, shape index: {}]   ;;  %s2248_s5 = inlined_call_operand.vmem [shape: f32[1,32], index: 5, kind: input, shape index: {}]   ;;  %s2249_s6 = inlined_call_operand.vmem [shape: f32[16,32], index: 6, kind: input, shape index: {}]   ;;  %s2250_s7 = inlined_call_operand.vmem [shape: f32[2,32,32], index: 7, kind: input, shape index: {}]   ;;  %s2251_s8 = inlined_call_operand.vmem [shape: f32[2,32,32], index: 8, kind: input, shape index: {}]   ;;  %s2252_s9 = inlined_call_operand.vmem [shape: f32[2,32,32], index: 9, kind: input, shape index: {}]   ;;  %s2253_s10 = inlined_call_operand.hbm [shape: f32[2,32,32], index: 10, kind: input, shape index: {}]   ;;  %s2254_s11 = inlined_call_operand.hbm [shape: f32[2,32,64], index: 11, kind: input, shape index: {}]   ;;  %s2255_s12 = inlined_call_operand.vmem [shape: f32[2,1,64], index: 12, kind: input, shape index: {}]   ;;  %s2256_s13 = inlined_call_operand.vmem [shape: f32[2,64,32], index: 13, kind: input, shape index: {}]   ;;  %s2257_s14 = inlined_call_operand.vmem [shape: f32[2,5,32], index: 14, kind: input, shape index: {}]   ;;  %s2258_s15 = inlined_call_operand.vmem [shape: f32[32,4], index: 15, kind: input, shape index: {}]   ;;  %s2259_s16 = inlined_call_operand.vmem [shape: f32[1,4], index: 16, kind: input, shape index: {}]   ;;  %s2260_s17 = inlined_call_operand.vmem [shape: f32[16,4], index: 17, kind: output, shape index: {0}]   ;;  %s2261_s18 = inlined_call_operand.vmem [shape: f32[16,4], index: 18, kind: output, shape index: {1}]   ;;  %s2262_s19 = inlined_call_operand.hbm [shape: f32[2], index: 19, kind: output, shape index: {2}]  }
   0x1   :  { %2267 = sst [smem:[#allocation11_spill]] %s2243_s0 }
   0x2   :  { %2268 = sst [smem:[#allocation12_spill]] %s2244_s1 }
   0x3   :  { %2269 = sst [smem:[#allocation13_spill]] %s2245_s2 }
   0x4   :  { %2270 = sst [smem:[#allocation14_spill]] %s2246_s3 }
   0x5   :  { %25 = vsyncpa [#allocation3], 0 }
   0x6   :  { %26 = vsyncpa [#allocation6], 0 }
   0x7   :  { %27 = vsyncpa [#allocation4], 0  ;;  %s52_s20 = sshll.u32 %s2253_s10, 4  ;;  %s1729_s21 = smov [#allocation2]   ;;  %s53_s20 = int_to_ptr.hbm [resolvable:$true] %s52_s20 }
   0x8   :  { %s54_s1 = sshll.u32 %s1729_s21, 4  ;;  %s65_s23 = sshll.u32 %s2254_s11, 4  ;;  %s55_s1 = int_to_ptr.vmem [resolvable:$true] %s54_s1  ;;  %s66_s23 = int_to_ptr.hbm [resolvable:$true] %s65_s23 }
   0x9   :  { %s1730_s24 = smov 128   ;;  %s1731_s25 = smov 8  }
   0xa   :  { %60 = dma.hbm_to_vmem [thread:$0]  %s53_s20, 1024, %s55_s1, [#allocation3], %s1730_s24, %s1730_s24, %s1731_s25  }
   0xb   :  { %s1732_s3 = smov [#allocation5]  }
   0xc   :  { %s67_s26 = sshll.u32 %s1732_s3, 4  ;;  %s68_s26 = int_to_ptr.vmem [resolvable:$true] %s67_s26 }
   0xd   :  { %73 = dma.hbm_to_vmem [thread:$0]  %s66_s23, 1024, %s68_s26, [#allocation6], %s1730_s24, %s1730_s24, %s1731_s25  }
   0xe   :  { %1723 = dma.done.wait [#allocation3], 1024  }
   0xf   :  { %1724 = vsyncadd [#allocation3], 4294966272 }
  0x10   :  { %1725 = dma.done.wait [#allocation6], 1024  }
  0x11   :  { %1726 = vsyncadd [#allocation6], 4294966272  ;;  %vm106_vm0 = vcmask 1043456   ;;  %vm99_vm1 = vcmask 31744   ;;  %v96_v0 = vld [vmem:[%s2247_s4] sm:$0xff]  ;;  %s2271_s29 = sld [smem:[#allocation11_spill]] }
  0x12   :  { %v98_v2 = vrot.slane %v96_v0, 4  ;;  %1505 = vmatpush.msk.msra.mxu1 %vm106_vm0, %v96_v0  ;;  %s2272_s20 = sld [smem:[#allocation12_spill]]  ;;  %1580 = vmatpush.msk.msra.mxu3 %vm106_vm0, %v96_v0  ;;  %v176_v6 = vld [vmem:[%s2250_s7 + $0x18] sm:$0xff]  ;;  %v175_v9 = vld [vmem:[%s2250_s7 + $0x10] sm:$0xff]  ;;  %v174_v12 = vld [vmem:[%s2250_s7 + $0x8] sm:$0xff]  ;;  %vm203_vm2 = vcmask 261120  }
  0x13   :  { %v180_v7 = vld [vmem:[%s2251_s8 + $0x18] sm:$0xff]  ;;  %222 = vmatpush.msra.mxu2 %v176_v6  ;;  %v179_v10 = vld [vmem:[%s2251_s8 + $0x10] sm:$0xff]  ;;  %v178_v13 = vld [vmem:[%s2251_s8 + $0x8] sm:$0xff]  ;;  %vm279_vm3 = vcmask 130048   ;;  %vm307_vm4 = vcmask 64512   ;;  %s1734_s1 = smov 16  }
  0x14   :  { %1502 = vmatpush.msk.msra.mxu0 %vm106_vm0, %v98_v2  ;;  %v184_v8 = vld [vmem:[%s2252_s9 + $0x18] sm:$0xff]  ;;  %245 = vmatpush.msrb.mxu3 %v180_v7  ;;  %v183_v11 = vld [vmem:[%s2252_s9 + $0x10] sm:$0xff]  ;;  %v182_v14 = vld [vmem:[%s2252_s9 + $0x8] sm:$0xff]  ;;  %vm668_vm12 = vcmask 523264   ;;  %s2273_s3 = sld [smem:[#allocation13_spill]]  ;;  %s1736_s23 = smov [#allocation7]  }
  0x15   :  { %223 = vmatpush.msra.mxu2 %v175_v9  ;;  %v173_v15 = vld [vmem:[%s2250_s7] sm:$0xff]  ;;  %v170_v28 = vld [vmem:[%s2249_s6 + $0x8] sm:$0xff]  ;;  %s2274_s28 = sld [smem:[#allocation14_spill]] }
  0x16   :  { %268 = vmatpush.msrb.mxu0 %v184_v8  ;;  %246 = vmatpush.msrb.mxu3 %v179_v10  ;;  %v177_v16 = vld [vmem:[%s2251_s8] sm:$0xff] }
  0x17   :  { %v92_v1 = vld [vmem:[%s2271_s29] sm:$0xff]  ;;  %v93_v4 = vld [vmem:[%s2271_s29 + $0x8] sm:$0xff]  ;;  %224 = vmatpush.msra.mxu2 %v174_v12 }
  0x18   :  { %v94_v3 = vld [vmem:[%s2272_s20] sm:$0xff]  ;;  %1506 = vmatmul.msk.f32.vlgmr.msra.gmra.mxu1 %vm99_vm1, %v92_v1  ;;  %1507 = vmatmul.msk.f32.vlgmr.msra.gmra.mxu3 %vm99_vm1, %v93_v4  ;;  %v95_v5 = vld [vmem:[%s2272_s20 + $0x8] sm:$0xff] }
  0x19   :  { %1503 = vmatmul.msk.f32.vlgmr.msra.gmra.mxu0 %vm99_vm1, %v94_v3  ;;  %247 = vmatpush.msrb.mxu3 %v178_v13  ;;  %v181_v17 = vld [vmem:[%s2252_s9] sm:$0xff] }
  0x1a   :  { %269 = vmatpush.msrb.mxu0 %v183_v11  ;;  %225 = vmatpush.msra.mxu2 %v173_v15  ;;  %v1601_v19 = vld [vmem:[%s2248_s5] ss:$0 sm:$0xff] }
  0x1b   :  { %248 = vmatpush.msrb.mxu3 %v177_v16  ;;  %v169_v22 = vld [vmem:[%s2249_s6] sm:$0xff]  ;;  %s1733_s6 = smov 112  }
  0x1c   :  { %270 = vmatpush.msrb.mxu0 %v182_v14 }
  0x1e   :  { %271 = vmatpush.msrb.mxu0 %v181_v17 }
  0x21   :  { %1504 = vmatmul.msk.f32.gmra.mxu0 %vm99_vm1, %v95_v5 }
  0x95   :  { %v157_v18 = vpop.f32.mrf.mxu1 }
  0x96   :  { %v126_v20 = vpop.f32.mrf.mxu0 }
  0x97   :  { %v158_v21 = vadd.f32 %v157_v18, %v126_v20 }
  0x99   :  { %v167_v23 = vadd.f32 %v1601_v19, %v158_v21 }
  0x9b   :  { %v1904_v24 = vadd.f32 %v169_v22, %v167_v23  ;;  %v160_v25 = vpop.f32.mrf.mxu3 }
  0x9d   :  { %1508 = vmatmul.msk.f32.vlgmr.msra.gmra.mxu2 %vm203_vm2, %v1904_v24  ;;  %1510 = vmatmul.msk.f32.vlgmr.msrb.gmra.mxu3 %vm203_vm2, %v1904_v24 }
  0x9e   :  { %1512 = vmatmul.msk.f32.vlgmr.msrb.gmra.mxu0 %vm203_vm2, %v1904_v24  ;;  %v129_v26 = vpop.f32.mrf.mxu0 }
  0x9f   :  { %v161_v27 = vadd.f32 %v160_v25, %v129_v26 }
  0xa1   :  { %v168_v29 = vadd.f32 %v1601_v19, %v161_v27  ;;  %v188_v27 = vld [vmem:[#allocation2 + $0x18] sm:$0xff] }
  0xa3   :  { %v1915_v30 = vadd.f32 %v170_v28, %v168_v29  ;;  %v187_v28 = vld [vmem:[#allocation2 + $0x10] sm:$0xff]  ;;  %v186_v29 = vld [vmem:[#allocation2 + $0x8] sm:$0xff] }
  0xa5   :  { %1511 = vmatmul.msk.f32.gmra.mxu3 %vm203_vm2, %v1915_v30  ;;  %1509 = vmatmul.msk.f32.gmra.mxu2 %vm203_vm2, %v1915_v30 }
  0xa6   :  { %1513 = vmatmul.msk.f32.gmra.mxu0 %vm203_vm2, %v1915_v30 }
 0x11b   :  { %v1923_v31 = vpop.f32.mrf.mxu0 }
 0x11c   :  { %337 = vmatpush.msrb.mxu2 %v1923_v31 }
 0x120   :  { %v227_v32 = vpop.f32.mrf.mxu2  ;;  %v250_v33 = vpop.f32.mrf.mxu3 }
 0x121   :  { %1514 = vmatpush.xpose.msk.msrb.mxu1 %vm279_vm3, %v250_v33  ;;  %342 = vrot.lane.b32.xlu1 %v227_v32, %s1733_s6 }
 0x123   :  { %v276_v42 = vpop.f32.mrf.mxu0 }
 0x124   :  { %1515 = vmatmul.msk.f32.vlgmr.msrb.gmra.mxu1 %vm279_vm3, %v227_v32 }
 0x128   :  { %v253_v34 = vpop.f32.mrf.mxu3  ;;  %v230_v35 = vpop.f32.mrf.mxu2 }
 0x129   :  { %477 = vrot.lane.b32.xlu1 %v253_v34, %s1733_s6  ;;  %475 = vrot.lane.b32.xlu2 %v230_v35, %s1733_s6 }
 0x12a   :  { %1520 = vmatpush.xpose.msk.msra.mxu2 %vm279_vm3, %v253_v34 }
 0x183   :  { %v476_v38 = vpop.permute.xlu2 %475 }
 0x193   :  { %v343_v36 = vpop.permute.xlu1 %342 }
 0x19b   :  { %v478_v37 = vpop.permute.xlu1 %477 }
 0x19c   :  { %1523 = vmatpush.xpose.msk.msra.mxu0 %vm279_vm3, %v478_v37 }
 0x19f   :  { %1524 = vmatmul.msk.f32.vlgmr.msra.gmra.mxu0 %vm279_vm3, %v476_v38 }
 0x1a1   :  { %v303_v39 = vpop.f32.mrf.mxu1 }
 0x1a2   :  { %v306_v40 = vmul.f32 0.25, %v303_v39 }
 0x1a4   :  { %v308_v41 = vsel %vm307_vm4, %v306_v40, -inf }
 0x1a5   :  { %309 = vmax.xlane.f32.xlu0 %v308_v41 }
 0x1b9   :  { %344 = vrot.lane.b32.xlu0 %v250_v33, %s1733_s6 }
 0x218   :  { %v310_v43 = vpop.xlane.xlu0 %309 }
 0x219   :  { %v311_v44 = vsub.f32 %v306_v40, %v310_v43  ;;  %v1735_v43 = vmov 32.0  }
 0x21b   :  { %v312_v45 = vmul.f32 1.442695, %v311_v44 }
 0x21c   :  { %v500_v46 = vpop.f32.mrf.mxu0 }
 0x21d   :  { %1605 = vpow2.f32 %v312_v45  ;;  %v503_v47 = vmul.f32 0.25, %v500_v46 }
 0x21f   :  { %v504_v48 = vsel %vm307_vm4, %v503_v47, -inf }
 0x220   :  { %505 = vmax.xlane.f32.xlu0 %v504_v48 }
 0x223   :  { %v1606_v49 = vpop.eup %1605 }
 0x224   :  { %v314_v50 = vsel %vm307_vm4, %v1606_v49, 0.0 }
 0x225   :  { %315 = vadd.xlane.f32.xlu2 %v314_v50 }
 0x22b   :  { %v345_v51 = vpop.permute.xlu0 %344 }
 0x22c   :  { %1517 = vmatpush.xpose.msk.msra.mxu3 %vm279_vm3, %v345_v51 }
 0x22f   :  { %1518 = vmatmul.msk.f32.vlgmr.msra.gmra.mxu3 %vm279_vm3, %v343_v36 }
 0x230   :  { %470 = vmatpush.msrb.mxu3 %v276_v42 }
 0x293   :  { %v506_v55 = vpop.xlane.xlu0 %505 }
 0x294   :  { %v507_v56 = vsub.f32 %v503_v47, %v506_v55 }
 0x296   :  { %v508_v57 = vmul.f32 1.442695, %v507_v56 }
 0x298   :  { %v316_v52 = vpop.xlane.xlu2 %315 }
 0x299   :  { %1607 = vrcp.f32 %v316_v52 }
 0x29a   :  { %1609 = vpow2.f32 %v508_v57 }
 0x29f   :  { %v1608_v53 = vpop.eup %1607 }
 0x2a0   :  { %v318_v54 = vmul.f32 %v1608_v53, %v1606_v49  ;;  %v1610_v61 = vpop.eup %1609 }
 0x2a1   :  { %v510_v62 = vsel %vm307_vm4, %v1610_v61, 0.0 }
 0x2a2   :  { %1516 = vmatmul.msk.f32.vlgmr.msrb.gmra.mxu2 %vm307_vm4, %v318_v54 }
 0x2a3   :  { %565 = vmatpush.msrb.mxu2 %v188_v27 }
 0x2a5   :  { %566 = vmatpush.msrb.mxu2 %v187_v28 }
 0x2a7   :  { %567 = vmatpush.msrb.mxu2 %v186_v29 }
 0x2aa   :  { %1521 = vmatmul.msk.f32.vlgmr.msra.gmra.mxu2 %vm279_vm3, %v230_v35 }
 0x2b2   :  { %v367_v58 = vpop.f32.mrf.mxu3 }
 0x2b3   :  { %v370_v59 = vmul.f32 0.25, %v367_v58  ;;  %v192_v58 = vld [vmem:[#allocation5 + $0x18] sm:$0xff] }
 0x2b4   :  { %654 = vmatpush.msra.mxu3 %v192_v58 }
 0x2b5   :  { %v371_v60 = vsel %vm307_vm4, %v370_v59, -inf }
 0x2b6   :  { %372 = vmax.xlane.f32.xlu1 %v371_v60  ;;  %v190_v60 = vld [vmem:[#allocation5 + $0x8] sm:$0xff] }
 0x2be   :  { %511 = vadd.xlane.f32.xlu1 %v510_v62 }
 0x2d7   :  { %516 = vrot.lane.b32.xlu1 %v276_v42, %s1733_s6 }
 0x325   :  { %v339_v1 = vpop.f32.mrf.mxu2 }
 0x329   :  { %v373_v63 = vpop.xlane.xlu1 %372 }
 0x32a   :  { %v374_v0 = vsub.f32 %v370_v59, %v373_v63  ;;  %v191_v59 = vld [vmem:[#allocation5 + $0x10] sm:$0xff] }
 0x32b   :  { %655 = vmatpush.msra.mxu3 %v191_v59 }
 0x32c   :  { %v375_v2 = vmul.f32 1.442695, %v374_v0 }
 0x32d   :  { %v437_v5 = vpop.f32.mrf.mxu2  ;;  %656 = vmatpush.msra.mxu3 %v190_v60 }
 0x32e   :  { %1611 = vpow2.f32 %v375_v2  ;;  %v440_v6 = vmul.f32 0.25, %v437_v5  ;;  %v201_v5 = vld [vmem:[%s2256_s13 + $0x38] sm:$0xff] }
 0x32f   :  { %683 = vmatpush.msrb.mxu0 %v201_v5  ;;  %v1537_v5 = vld [vmem:[%s2251_s8 + $0x28] sm:$0xff] }
 0x330   :  { %v441_v7 = vsel %vm307_vm4, %v440_v6, -inf }
 0x331   :  { %v512_v11 = vpop.xlane.xlu1 %511 }
 0x334   :  { %v1612_v3 = vpop.eup %1611 }
 0x335   :  { %v377_v4 = vsel %vm307_vm4, %v1612_v3, 0.0 }
 0x336   :  { %378 = vadd.xlane.f32.xlu2 %v377_v4 }
 0x33e   :  { %442 = vmax.xlane.f32.xlu2 %v441_v7  ;;  %v1979_v7 = vld [vmem:[%s2257_s14] sm:$0x1f] }
 0x349   :  { %v517_v16 = vpop.permute.xlu1 %516 }
 0x356   :  { %383 = vrot.lane.b32.xlu2 %v1923_v31, %s1733_s6  ;;  %v185_v31 = vld [vmem:[#allocation2] sm:$0xff] }
 0x357   :  { %568 = vmatpush.msrb.mxu2 %v185_v31 }
 0x3a9   :  { %v379_v8 = vpop.xlane.xlu2 %378 }
 0x3aa   :  { %1613 = vrcp.f32 %v379_v8 }
 0x3b0   :  { %v1614_v13 = vpop.eup %1613 }
 0x3b1   :  { %v443_v9 = vpop.xlane.xlu2 %442  ;;  %v381_v14 = vmul.f32 %v1614_v13, %v1612_v3  ;;  %v198_v13 = vld [vmem:[%s2256_s13 + $0x20] sm:$0xff] }
 0x3b2   :  { %v444_v10 = vsub.f32 %v440_v6, %v443_v9  ;;  %v200_v6 = vld [vmem:[%s2256_s13 + $0x30] sm:$0xff]  ;;  %v199_v9 = vld [vmem:[%s2256_s13 + $0x28] sm:$0xff] }
 0x3b3   :  { %684 = vmatpush.msrb.mxu0 %v200_v6  ;;  %v1541_v6 = vld [vmem:[%s2252_s9 + $0x28] sm:$0xff] }
 0x3b4   :  { %v445_v12 = vmul.f32 1.442695, %v444_v10 }
 0x3b5   :  { %685 = vmatpush.msrb.mxu0 %v199_v9  ;;  %v1536_v9 = vld [vmem:[%s2251_s8 + $0x20] sm:$0xff] }
 0x3b6   :  { %1615 = vpow2.f32 %v445_v12 }
 0x3b7   :  { %1617 = vrcp.f32 %v512_v11  ;;  %686 = vmatpush.msrb.mxu0 %v198_v13 }
 0x3b9   :  { %v384_v15 = vpop.permute.xlu2 %383 }
 0x3ba   :  { %404 = vmatpush.msra.mxu1 %v384_v15 }
 0x3bb   :  { %1519 = vmatmul.msk.f32.vlgmr.msra.gmra.mxu1 %vm307_vm4, %v381_v14  ;;  %v627_v14 = vperm.slane %v1979_v7, 0 }
 0x3bc   :  { %v1616_v17 = vpop.eup %1615  ;;  %537 = vmatpush.msrb.mxu1 %v517_v16 }
 0x3bd   :  { %v447_v18 = vsel %vm307_vm4, %v1616_v17, 0.0  ;;  %v1618_v19 = vpop.eup %1617 }
 0x3be   :  { %448 = vadd.xlane.f32.xlu0 %v447_v18  ;;  %v514_v20 = vmul.f32 %v1618_v19, %v1610_v61  ;;  %v189_v61 = vld [vmem:[#allocation5] sm:$0xff]  ;;  %v630_v19 = vperm.slane %v1979_v7, 1 }
 0x3bf   :  { %657 = vmatpush.msra.mxu3 %v189_v61 }
 0x3c3   :  { %1525 = vmatmul.msk.f32.vlgmr.msrb.gmra.mxu1 %vm307_vm4, %v514_v20 }
 0x431   :  { %v449_v21 = vpop.xlane.xlu0 %448 }
 0x432   :  { %1619 = vrcp.f32 %v449_v21 }
 0x433   :  { %1621 = vrcp.f32 %v1735_v43 }
 0x438   :  { %v1620_v22 = vpop.eup %1619  ;;  %v406_v23 = vpop.f32.mrf.mxu1 }
 0x439   :  { %v451_v25 = vmul.f32 %v1620_v22, %v1616_v17  ;;  %410 = vrot.lane.b32.xlu0 %v406_v23, %s1734_s1  ;;  %v1622_v44 = vpop.eup %1621  ;;  %v197_v17 = vld [vmem:[%s2256_s13 + $0x18] sm:$0xff] }
 0x43a   :  { %v583_v45 = vmul.f32 32.0, %v1622_v44  ;;  %vm587_vm5 = vweird.f32 %v1622_v44  ;;  %687 = vmatpush.msrb.mxu0 %v197_v17 }
 0x43b   :  { %1522 = vmatmul.msk.f32.vlgmr.msrb.gmra.mxu3 %vm307_vm4, %v451_v25 }
 0x43c   :  { %v584_v46 = vsub.f32 1.0, %v583_v45 }
 0x43e   :  { %v585_v47 = vmul.f32 %v1622_v44, %v584_v46 }
 0x440   :  { %v539_v26 = vpop.f32.mrf.mxu1  ;;  %v586_v48 = vadd.f32 %v1622_v44, %v585_v47 }
 0x441   :  { %543 = vrot.lane.b32.xlu2 %v539_v26, %s1734_s1 }
 0x442   :  { %v1963_v49 = vsel %vm587_vm5, %v1622_v44, %v586_v48  ;;  %v667_v44 = vperm.slane %v1979_v7, 2 }
 0x49b   :  { %v544_v34 = vpop.permute.xlu2 %543 }
 0x4ab   :  { %v411_v32 = vpop.permute.xlu0 %410 }
 0x4ac   :  { %v413_v33 = vsel %vm279_vm3, %v339_v1, %v411_v32 }
 0x4ad   :  { %1526 = vmatmul.msk.f32.vlgmr.msrb.gmra.mxu2 %vm203_vm2, %v413_v33 }
 0x4be   :  { %v472_v35 = vpop.f32.mrf.mxu3 }
 0x4bf   :  { %v546_v36 = vsel %vm279_vm3, %v472_v35, %v544_v34  ;;  %v196_v34 = vld [vmem:[%s2256_s13 + $0x10] sm:$0xff]  ;;  %v195_v35 = vld [vmem:[%s2256_s13 + $0x8] sm:$0xff] }
 0x4c0   :  { %1527 = vmatmul.msk.f32.gmra.mxu2 %vm203_vm2, %v546_v36  ;;  %688 = vmatpush.msrb.mxu0 %v196_v34  ;;  %v194_v36 = vld [vmem:[%s2256_s13] sm:$0xff] }
 0x4c2   :  { %689 = vmatpush.msrb.mxu0 %v195_v35 }
 0x4c4   :  { %690 = vmatpush.msrb.mxu0 %v194_v36 }
 0x530   :  { %v570_v37 = vpop.f32.mrf.mxu2 }
 0x531   :  { %v571_v38 = vadd.f32 %v570_v37, %v1904_v24  ;;  %v1602_v37 = vld [vmem:[%s2255_s12] ss:$0 sm:$0xff] }
 0x533   :  { %v576_v39 = vsel %vm203_vm2, %v571_v38, 0.0 }
 0x534   :  { %577 = vadd.xlane.f32.xlu1 %v576_v39 }
 0x543   :  { %v573_v40 = vpop.f32.mrf.mxu2 }
 0x544   :  { %v574_v41 = vadd.f32 %v573_v40, %v1915_v30 }
 0x546   :  { %v579_v42 = vsel %vm203_vm2, %v574_v41, 0.0 }
 0x547   :  { %580 = vadd.xlane.f32.xlu2 %v579_v42 }
 0x5a7   :  { %v578_v24 = vpop.xlane.xlu1 %577 }
 0x5a8   :  { %v589_v50 = vmul.f32 %v1963_v49, %v578_v24 }
 0x5aa   :  { %v591_v51 = vsub.f32 %v571_v38, %v589_v50 }
 0x5ac   :  { %v593_v52 = vmul.f32 %v591_v51, %v591_v51 }
 0x5ae   :  { %v595_v30 = vsel %vm203_vm2, %v593_v52, 0.0 }
 0x5af   :  { %596 = vadd.xlane.f32.xlu0 %v595_v30 }
 0x5ba   :  { %v581_v53 = vpop.xlane.xlu2 %580 }
 0x5bb   :  { %v590_v54 = vmul.f32 %v1963_v49, %v581_v53 }
 0x5bd   :  { %v592_v55 = vsub.f32 %v574_v41, %v590_v54 }
 0x5bf   :  { %v594_v56 = vmul.f32 %v592_v55, %v592_v55 }
 0x5c1   :  { %v598_v57 = vsel %vm203_vm2, %v594_v56, 0.0 }
 0x5c2   :  { %599 = vadd.xlane.f32.xlu1 %v598_v57 }
 0x622   :  { %v597_v62 = vpop.xlane.xlu0 %596 }
 0x623   :  { %v601_v63 = vmul.f32 %v597_v62, %v1963_v49  ;;  %v1535_v62 = vld [vmem:[%s2250_s7 + $0x38] sm:$0xff] }
 0x624   :  { %806 = vmatpush.msra.mxu1 %v1535_v62 }
 0x625   :  { %v603_v0 = vadd.f32 1e-06, %v601_v63  ;;  %v1539_v63 = vld [vmem:[%s2251_s8 + $0x38] sm:$0xff] }
 0x626   :  { %829 = vmatpush.msra.mxu2 %v1539_v63 }
 0x627   :  { %1623 = vrsqrt.f32 %v603_v0  ;;  %vm611_vm7 = vweird.f32 %v603_v0 }
 0x62d   :  { %v1624_v1 = vpop.eup %1623 }
 0x62e   :  { %v606_v2 = vmul.f32 %v1624_v1, %v603_v0  ;;  %vm612_vm6 = vweird.f32 %v1624_v1  ;;  %v1543_v0 = vld [vmem:[%s2252_s9 + $0x38] sm:$0xff] }
 0x62f   :  { %vm613_vm8 = vmor %vm611_vm7, %vm612_vm6  ;;  %852 = vmatpush.msrb.mxu3 %v1543_v0 }
 0x630   :  { %v607_v3 = vmul.f32 %v1624_v1, %v606_v2  ;;  %v1538_v2 = vld [vmem:[%s2251_s8 + $0x30] sm:$0xff] }
 0x631   :  { %830 = vmatpush.msra.mxu2 %v1538_v2 }
 0x632   :  { %v608_v4 = vmul.f32 0.5, %v607_v3  ;;  %v1542_v3 = vld [vmem:[%s2252_s9 + $0x30] sm:$0xff] }
 0x633   :  { %853 = vmatpush.msrb.mxu3 %v1542_v3  ;;  %831 = vmatpush.msra.mxu2 %v1537_v5 }
 0x634   :  { %v609_v8 = vsub.f32 1.5, %v608_v4  ;;  %v1533_v4 = vld [vmem:[%s2250_s7 + $0x28] sm:$0xff] }
 0x635   :  { %v600_v10 = vpop.xlane.xlu1 %599  ;;  %854 = vmatpush.msrb.mxu3 %v1541_v6  ;;  %832 = vmatpush.msra.mxu2 %v1536_v9 }
 0x636   :  { %v610_v11 = vmul.f32 %v1624_v1, %v609_v8  ;;  %v602_v12 = vmul.f32 %v600_v10, %v1963_v49  ;;  %v1532_v8 = vld [vmem:[%s2250_s7 + $0x20] sm:$0xff] }
 0x637   :  { %v1540_v10 = vld [vmem:[%s2252_s9 + $0x20] sm:$0xff] }
 0x638   :  { %v614_v15 = vsel %vm613_vm8, %v1624_v1, %v610_v11  ;;  %v604_v16 = vadd.f32 1e-06, %v602_v12  ;;  %v1534_v1 = vld [vmem:[%s2250_s7 + $0x30] sm:$0xff]  ;;  %855 = vmatpush.msrb.mxu3 %v1540_v10 }
 0x639   :  { %v625_v18 = vmul.f32 %v614_v15, %v591_v51  ;;  %807 = vmatpush.msra.mxu1 %v1534_v1 }
 0x63a   :  { %1625 = vrsqrt.f32 %v604_v16  ;;  %vm621_vm10 = vweird.f32 %v604_v16 }
 0x63b   :  { %v628_v20 = vmul.f32 %v627_v14, %v625_v18  ;;  %808 = vmatpush.msra.mxu1 %v1533_v4 }
 0x63d   :  { %v631_v21 = vadd.f32 %v630_v19, %v628_v20  ;;  %809 = vmatpush.msra.mxu1 %v1532_v8 }
 0x63f   :  { %1528 = vmatmul.msk.f32.vlgmr.msra.gmra.mxu3 %vm203_vm2, %v631_v21 }
 0x640   :  { %v1626_v22 = vpop.eup %1625 }
 0x641   :  { %v616_v23 = vmul.f32 %v1626_v22, %v604_v16  ;;  %vm622_vm9 = vweird.f32 %v1626_v22 }
 0x642   :  { %vm623_vm11 = vmor %vm621_vm10, %vm622_vm9 }
 0x643   :  { %v617_v25 = vmul.f32 %v1626_v22, %v616_v23 }
 0x645   :  { %v618_v26 = vmul.f32 0.5, %v617_v25 }
 0x647   :  { %v619_v27 = vsub.f32 1.5, %v618_v26 }
 0x649   :  { %v620_v28 = vmul.f32 %v1626_v22, %v619_v27  ;;  %v747_v27 = vperm.slane %v1979_v7, 4 }
 0x64b   :  { %v624_v29 = vsel %vm623_vm11, %v1626_v22, %v620_v28  ;;  %v744_v22 = vperm.slane %v1979_v7, 3 }
 0x64c   :  { %v626_v31 = vmul.f32 %v624_v29, %v592_v55 }
 0x64e   :  { %v629_v32 = vmul.f32 %v627_v14, %v626_v31 }
 0x650   :  { %v632_v33 = vadd.f32 %v630_v19, %v629_v32 }
 0x652   :  { %1529 = vmatmul.msk.f32.gmra.mxu3 %vm203_vm2, %v632_v33 }
 0x6c2   :  { %v659_v38 = vpop.f32.mrf.mxu3 }
 0x6c3   :  { %v660_v39 = vadd.f32 %v1602_v37, %v659_v38 }
 0x6c5   :  { %v665_v40 = vmax.f32 %v660_v39, 0.0 }
 0x6c7   :  { %1530 = vmatmul.msk.f32.vlgmr.msrb.gmra.mxu0 %vm668_vm12, %v665_v40 }
 0x6d5   :  { %v662_v41 = vpop.f32.mrf.mxu3 }
 0x6d6   :  { %v663_v42 = vadd.f32 %v1602_v37, %v662_v41 }
 0x6d8   :  { %v666_v43 = vmax.f32 %v663_v42, 0.0 }
 0x6da   :  { %1531 = vmatmul.msk.f32.gmra.mxu0 %vm668_vm12, %v666_v43 }
 0x744   :  { %v692_v45 = vpop.f32.mrf.mxu0 }
 0x745   :  { %v693_v46 = vadd.f32 %v692_v45, %v667_v44 }
 0x747   :  { %v698_v47 = vadd.f32 %v693_v46, %v631_v21 }
 0x749   :  { %v700_v48 = vsel %vm203_vm2, %v698_v47, 0.0 }
 0x74a   :  { %701 = vadd.xlane.f32.xlu2 %v700_v48 }
 0x757   :  { %v695_v24 = vpop.f32.mrf.mxu0 }
 0x758   :  { %v696_v50 = vadd.f32 %v695_v24, %v667_v44 }
 0x75a   :  { %v699_v51 = vadd.f32 %v696_v50, %v632_v33 }
 0x75c   :  { %v703_v52 = vsel %vm203_vm2, %v699_v51, 0.0 }
 0x75d   :  { %704 = vadd.xlane.f32.xlu0 %v703_v52 }
 0x7bd   :  { %v702_v30 = vpop.xlane.xlu2 %701 }
 0x7be   :  { %v706_v53 = vmul.f32 %v702_v30, %v1963_v49 }
 0x7c0   :  { %v708_v54 = vsub.f32 %v698_v47, %v706_v53 }
 0x7c2   :  { %v710_v55 = vmul.f32 %v708_v54, %v708_v54 }
 0x7c4   :  { %v712_v56 = vsel %vm203_vm2, %v710_v55, 0.0 }
 0x7c5   :  { %713 = vadd.xlane.f32.xlu1 %v712_v56 }
 0x7d0   :  { %v705_v57 = vpop.xlane.xlu0 %704 }
 0x7d1   :  { %v707_v58 = vmul.f32 %v705_v57, %v1963_v49 }
 0x7d3   :  { %v2015_v59 = vsub.f32 %v699_v51, %v707_v58 }
 0x7d5   :  { %v711_v60 = vmul.f32 %v2015_v59, %v2015_v59 }
 0x7d7   :  { %v715_v61 = vsel %vm203_vm2, %v711_v60, 0.0 }
 0x7d8   :  { %716 = vadd.xlane.f32.xlu2 %v715_v61 }
 0x838   :  { %v714_v11 = vpop.xlane.xlu1 %713 }
 0x839   :  { %v718_v12 = vmul.f32 %v714_v11, %v1963_v49 }
 0x83b   :  { %v720_v13 = vadd.f32 1e-06, %v718_v12 }
 0x83d   :  { %1627 = vrsqrt.f32 %v720_v13  ;;  %vm728_vm14 = vweird.f32 %v720_v13 }
 0x843   :  { %v1628_v14 = vpop.eup %1627 }
 0x844   :  { %v723_v15 = vmul.f32 %v1628_v14, %v720_v13  ;;  %vm729_vm13 = vweird.f32 %v1628_v14 }
 0x845   :  { %vm730_vm15 = vmor %vm728_vm14, %vm729_vm13 }
 0x846   :  { %v724_v16 = vmul.f32 %v1628_v14, %v723_v15 }
 0x848   :  { %v725_v17 = vmul.f32 0.5, %v724_v16 }
 0x84a   :  { %v726_v18 = vsub.f32 1.5, %v725_v17 }
 0x84b   :  { %v717_v19 = vpop.xlane.xlu2 %716 }
 0x84c   :  { %v727_v20 = vmul.f32 %v1628_v14, %v726_v18  ;;  %v719_v21 = vmul.f32 %v717_v19, %v1963_v49 }
 0x84e   :  { %v731_v23 = vsel %vm730_vm15, %v1628_v14, %v727_v20  ;;  %v721_v25 = vadd.f32 1e-06, %v719_v21 }
 0x84f   :  { %v742_v26 = vmul.f32 %v731_v23, %v708_v54 }
 0x850   :  { %1629 = vrsqrt.f32 %v721_v25  ;;  %vm738_vm5 = vweird.f32 %v721_v25 }
 0x851   :  { %v745_v28 = vmul.f32 %v744_v22, %v742_v26 }
 0x853   :  { %v2060_v29 = vadd.f32 %v747_v27, %v745_v28 }
 0x855   :  { %1554 = vmatmul.msk.f32.vlgmr.msra.gmra.mxu1 %vm203_vm2, %v2060_v29  ;;  %1556 = vmatmul.msk.f32.vlgmr.msra.gmra.mxu2 %vm203_vm2, %v2060_v29 }
 0x856   :  { %v1630_v31 = vpop.eup %1629  ;;  %1558 = vmatmul.msk.f32.vlgmr.msrb.gmra.mxu3 %vm203_vm2, %v2060_v29 }
 0x857   :  { %v733_v32 = vmul.f32 %v1630_v31, %v721_v25  ;;  %vm739_vm0 = vweird.f32 %v1630_v31 }
 0x858   :  { %vm740_vm6 = vmor %vm738_vm5, %vm739_vm0 }
 0x859   :  { %v734_v33 = vmul.f32 %v1630_v31, %v733_v32 }
 0x85b   :  { %v735_v34 = vmul.f32 0.5, %v734_v33 }
 0x85d   :  { %v736_v35 = vsub.f32 1.5, %v735_v34 }
 0x85f   :  { %v737_v7 = vmul.f32 %v1630_v31, %v736_v35  ;;  %v769_v35 = vld [vmem:[#allocation2 + $0x38] sm:$0xff] }
 0x861   :  { %v741_v36 = vsel %vm740_vm6, %v1630_v31, %v737_v7  ;;  %v768_v7 = vld [vmem:[#allocation2 + $0x30] sm:$0xff] }
 0x862   :  { %v743_v37 = vmul.f32 %v741_v36, %v2015_v59  ;;  %v767_v36 = vld [vmem:[#allocation2 + $0x28] sm:$0xff] }
 0x864   :  { %v746_v38 = vmul.f32 %v744_v22, %v743_v37 }
 0x866   :  { %v2069_v39 = vadd.f32 %v747_v27, %v746_v38 }
 0x868   :  { %1555 = vmatmul.msk.f32.gmra.mxu1 %vm203_vm2, %v2069_v39  ;;  %1557 = vmatmul.msk.f32.gmra.mxu2 %vm203_vm2, %v2069_v39 }
 0x869   :  { %1559 = vmatmul.msk.f32.gmra.mxu3 %vm203_vm2, %v2069_v39 }
 0x8d2   :  { %v811_v40 = vpop.f32.mrf.mxu1 }
 0x8d3   :  { %924 = vrot.lane.b32.xlu1 %v811_v40, %s1733_s6 }
 0x8d8   :  { %v834_v41 = vpop.f32.mrf.mxu2 }
 0x8d9   :  { %v2078_v42 = vpop.f32.mrf.mxu3  ;;  %926 = vrot.lane.b32.xlu0 %v834_v41, %s1733_s6  ;;  %1560 = vmatpush.xpose.msk.msrb.mxu1 %vm279_vm3, %v834_v41 }
 0x8da   :  { %919 = vmatpush.msra.mxu0 %v2078_v42 }
 0x8dc   :  { %1561 = vmatmul.msk.f32.vlgmr.msrb.gmra.mxu1 %vm279_vm3, %v811_v40  ;;  %v766_v40 = vld [vmem:[#allocation2 + $0x20] sm:$0xff] }
 0x8e5   :  { %v814_v43 = vpop.f32.mrf.mxu1 }
 0x8e6   :  { %1057 = vrot.lane.b32.xlu0 %v814_v43, %s1733_s6 }
 0x8eb   :  { %v837_v44 = vpop.f32.mrf.mxu2 }
 0x8ec   :  { %v860_v45 = vpop.f32.mrf.mxu3  ;;  %1059 = vrot.lane.b32.xlu2 %v837_v44, %s1733_s6  ;;  %1566 = vmatpush.xpose.msk.msra.mxu3 %vm279_vm3, %v837_v44 }
 0x8ed   :  { %1052 = vmatpush.msrb.mxu0 %v860_v45 }
 0x8ef   :  { %1567 = vmatmul.msk.f32.vlgmr.msra.gmra.mxu3 %vm279_vm3, %v814_v43 }
 0x8f0   :  { %1147 = vmatpush.msrb.mxu3 %v769_v35 }
 0x8f2   :  { %1148 = vmatpush.msrb.mxu3 %v768_v7 }
 0x8f4   :  { %1149 = vmatpush.msrb.mxu3 %v767_v36 }
 0x8f6   :  { %1150 = vmatpush.msrb.mxu3 %v766_v40  ;;  %v1545_v40 = vld [vmem:[%s2256_s13 + $0x40] sm:$0xff] }
 0x945   :  { %v925_v48 = vpop.permute.xlu1 %924 }
 0x946   :  { %v1060_v47 = vpop.permute.xlu2 %1059 }
 0x94b   :  { %v927_v46 = vpop.permute.xlu0 %926 }
 0x94c   :  { %1563 = vmatpush.xpose.msk.msra.mxu1 %vm279_vm3, %v927_v46 }
 0x94f   :  { %1564 = vmatmul.msk.f32.vlgmr.msra.gmra.mxu1 %vm279_vm3, %v925_v48 }
 0x950   :  { %1569 = vmatpush.xpose.msk.msrb.mxu1 %vm279_vm3, %v1060_v47 }
 0x958   :  { %v1058_v24 = vpop.permute.xlu0 %1057 }
 0x959   :  { %v886_v50 = vpop.f32.mrf.mxu1  ;;  %1570 = vmatmul.msk.f32.vlgmr.msrb.gmra.mxu1 %vm279_vm3, %v1058_v24 }
 0x95a   :  { %v889_v51 = vmul.f32 0.25, %v886_v50 }
 0x95c   :  { %v890_v52 = vsel %vm307_vm4, %v889_v51, -inf }
 0x95d   :  { %891 = vmax.xlane.f32.xlu2 %v890_v52 }
 0x972   :  { %v1019_v58 = vpop.f32.mrf.mxu3 }
 0x973   :  { %v1022_v59 = vmul.f32 0.25, %v1019_v58 }
 0x975   :  { %v1023_v60 = vsel %vm307_vm4, %v1022_v59, -inf }
 0x9cc   :  { %v949_v30 = vpop.f32.mrf.mxu1 }
 0x9cd   :  { %v952_v53 = vmul.f32 0.25, %v949_v30 }
 0x9cf   :  { %v953_v54 = vsel %vm307_vm4, %v952_v53, -inf }
 0x9d0   :  { %954 = vmax.xlane.f32.xlu1 %v953_v54  ;;  %v892_v0 = vpop.xlane.xlu2 %891 }
 0x9d1   :  { %v893_v5 = vsub.f32 %v889_v51, %v892_v0 }
 0x9d3   :  { %v894_v8 = vmul.f32 1.442695, %v893_v5 }
 0x9d6   :  { %v1082_v55 = vpop.f32.mrf.mxu1 }
 0x9d7   :  { %v1085_v56 = vmul.f32 0.25, %v1082_v55 }
 0x9d9   :  { %v1086_v57 = vsel %vm307_vm4, %v1085_v56, -inf }
 0x9da   :  { %1087 = vmax.xlane.f32.xlu0 %v1086_v57 }
 0x9e2   :  { %1024 = vmax.xlane.f32.xlu0 %v1023_v60 }
 0x9f6   :  { %1098 = vrot.lane.b32.xlu0 %v860_v45, %s1733_s6 }
 0xa43   :  { %v955_v61 = vpop.xlane.xlu1 %954 }
 0xa44   :  { %v956_v62 = vsub.f32 %v952_v53, %v955_v61  ;;  %v773_v61 = vld [vmem:[#allocation5 + $0x30] sm:$0xff] }
 0xa46   :  { %v957_v63 = vmul.f32 1.442695, %v956_v62  ;;  %v772_v62 = vld [vmem:[#allocation5 + $0x28] sm:$0xff] }
 0xa48   :  { %1631 = vpow2.f32 %v957_v63  ;;  %v771_v63 = vld [vmem:[#allocation5 + $0x20] sm:$0xff] }
 0xa4d   :  { %v1088_v1 = vpop.xlane.xlu0 %1087 }
 0xa4e   :  { %v1632_v2 = vpop.eup %1631  ;;  %v1089_v3 = vsub.f32 %v1085_v56, %v1088_v1 }
 0xa4f   :  { %v959_v4 = vsel %vm307_vm4, %v1632_v2, 0.0 }
 0xa50   :  { %v1090_v6 = vmul.f32 1.442695, %v1089_v3  ;;  %960 = vadd.xlane.f32.xlu1 %v959_v4 }
 0xa52   :  { %1633 = vpow2.f32 %v1090_v6 }
 0xa53   :  { %1635 = vpow2.f32 %v894_v8  ;;  %v2125_v8 = vld [vmem:[%s2257_s14 + $0x8] sm:$0x1f] }
 0xa55   :  { %v1025_v9 = vpop.xlane.xlu0 %1024 }
 0xa56   :  { %v1026_v11 = vsub.f32 %v1022_v59, %v1025_v9 }
 0xa58   :  { %v1634_v10 = vpop.eup %1633  ;;  %v1027_v13 = vmul.f32 1.442695, %v1026_v11  ;;  %v1202_v11 = vperm.slane %v2125_v8, 0 }
 0xa59   :  { %v1092_v12 = vsel %vm307_vm4, %v1634_v10, 0.0  ;;  %v1636_v14 = vpop.eup %1635 }
 0xa5a   :  { %1093 = vadd.xlane.f32.xlu2 %v1092_v12  ;;  %1637 = vpow2.f32 %v1027_v13  ;;  %v896_v15 = vsel %vm307_vm4, %v1636_v14, 0.0 }
 0xa60   :  { %v1638_v16 = vpop.eup %1637 }
 0xa61   :  { %v1029_v17 = vsel %vm307_vm4, %v1638_v16, 0.0 }
 0xa62   :  { %897 = vadd.xlane.f32.xlu2 %v896_v15 }
 0xa68   :  { %v1099_v26 = vpop.permute.xlu0 %1098 }
 0xa69   :  { %965 = vrot.lane.b32.xlu1 %v2078_v42, %s1733_s6 }
 0xa6a   :  { %1030 = vadd.xlane.f32.xlu2 %v1029_v17  ;;  %v1552_v17 = vld [vmem:[%s2256_s13 + $0x78] sm:$0xff] }
 0xa6b   :  { %1257 = vmatpush.msra.mxu1 %v1552_v17 }
 0xac3   :  { %v961_v19 = vpop.xlane.xlu1 %960 }
 0xac4   :  { %1639 = vrcp.f32 %v961_v19  ;;  %v1550_v19 = vld [vmem:[%s2256_s13 + $0x68] sm:$0xff] }
 0xaca   :  { %v1640_v21 = vpop.eup %1639 }
 0xacb   :  { %v963_v22 = vmul.f32 %v1640_v21, %v1632_v2 }
 0xacd   :  { %v1094_v18 = vpop.xlane.xlu2 %1093 }
 0xad5   :  { %v898_v20 = vpop.xlane.xlu2 %897 }
 0xad6   :  { %1641 = vrcp.f32 %v898_v20 }
 0xad7   :  { %1643 = vrcp.f32 %v1094_v18  ;;  %v1551_v18 = vld [vmem:[%s2256_s13 + $0x70] sm:$0xff] }
 0xad8   :  { %1258 = vmatpush.msra.mxu1 %v1551_v18  ;;  %v1321_v18 = vperm.slane %v2125_v8, 4 }
 0xada   :  { %1259 = vmatpush.msra.mxu1 %v1550_v19 }
 0xadb   :  { %v966_v23 = vpop.permute.xlu1 %965 }
 0xadc   :  { %v1642_v25 = vpop.eup %1641  ;;  %986 = vmatpush.msrb.mxu2 %v966_v23 }
 0xadd   :  { %v900_v27 = vmul.f32 %v1642_v25, %v1636_v14  ;;  %1565 = vmatmul.msk.f32.vlgmr.msrb.gmra.mxu2 %vm307_vm4, %v963_v22  ;;  %v1031_v28 = vpop.xlane.xlu2 %1030  ;;  %v1644_v31 = vpop.eup %1643  ;;  %v1205_v14 = vperm.slane %v2125_v8, 1  ;;  %v1549_v22 = vld [vmem:[%s2256_s13 + $0x60] sm:$0xff]  ;;  %v1548_v25 = vld [vmem:[%s2256_s13 + $0x58] sm:$0xff] }
 0xade   :  { %1119 = vmatpush.msra.mxu2 %v1099_v26  ;;  %1645 = vrcp.f32 %v1031_v28  ;;  %v1096_v32 = vmul.f32 %v1644_v31, %v1634_v10  ;;  %1260 = vmatpush.msra.mxu1 %v1549_v22 }
 0xadf   :  { %1562 = vmatmul.msk.f32.vlgmr.msra.gmra.mxu0 %vm307_vm4, %v900_v27 }
 0xae0   :  { %1261 = vmatpush.msra.mxu1 %v1548_v25 }
 0xae4   :  { %v1646_v33 = vpop.eup %1645 }
 0xae5   :  { %v1033_v34 = vmul.f32 %v1646_v33, %v1638_v16  ;;  %1571 = vmatmul.msk.f32.vlgmr.msra.gmra.mxu2 %vm307_vm4, %v1096_v32 }
 0xae7   :  { %1568 = vmatmul.msk.f32.vlgmr.msrb.gmra.mxu0 %vm307_vm4, %v1033_v34 }
 0xb5c   :  { %v921_v41 = vpop.f32.mrf.mxu0 }
 0xb60   :  { %v988_v37 = vpop.f32.mrf.mxu2 }
 0xb61   :  { %992 = vrot.lane.b32.xlu2 %v988_v37, %s1734_s1  ;;  %v1547_v37 = vld [vmem:[%s2256_s13 + $0x50] sm:$0xff] }
 0xb62   :  { %1262 = vmatpush.msra.mxu1 %v1547_v37 }
 0xb64   :  { %v1054_v44 = vpop.f32.mrf.mxu0 }
 0xb68   :  { %v1121_v38 = vpop.f32.mrf.mxu2 }
 0xb69   :  { %1125 = vrot.lane.b32.xlu0 %v1121_v38, %s1734_s1  ;;  %v1546_v38 = vld [vmem:[%s2256_s13 + $0x48] sm:$0xff] }
 0xb6a   :  { %1263 = vmatpush.msra.mxu1 %v1546_v38  ;;  %v1660_v38 = vld [vmem:[%s2271_s29] sm:$0xff] }
 0xb6c   :  { %1264 = vmatpush.msra.mxu1 %v1545_v40 }
 0xbbb   :  { %v993_v42 = vpop.permute.xlu2 %992 }
 0xbbc   :  { %v995_v43 = vsel %vm279_vm3, %v921_v41, %v993_v42  ;;  %v1603_v41 = vld [vmem:[%s2255_s12 + $0x1] ss:$0 sm:$0xff] }
 0xbbd   :  { %1572 = vmatmul.msk.f32.vlgmr.msrb.gmra.mxu3 %vm203_vm2, %v995_v43 }
 0xbdb   :  { %v1126_v45 = vpop.permute.xlu0 %1125 }
 0xbdc   :  { %v1128_v46 = vsel %vm279_vm3, %v1054_v44, %v1126_v45 }
 0xbdd   :  { %1573 = vmatmul.msk.f32.gmra.mxu3 %vm203_vm2, %v1128_v46 }
 0xc40   :  { %v1152_v47 = vpop.f32.mrf.mxu3 }
 0xc41   :  { %v1153_v48 = vadd.f32 %v1152_v47, %v2060_v29 }
 0xc43   :  { %v1158_v24 = vsel %vm203_vm2, %v1153_v48, 0.0 }
 0xc44   :  { %1159 = vadd.xlane.f32.xlu1 %v1158_v24 }
 0xc60   :  { %v1155_v50 = vpop.f32.mrf.mxu3 }
 0xc61   :  { %v1156_v51 = vadd.f32 %v1155_v50, %v2069_v39  ;;  %v774_v39 = vld [vmem:[#allocation5 + $0x38] sm:$0xff] }
 0xc62   :  { %1229 = vmatpush.msra.mxu0 %v774_v39 }
 0xc63   :  { %v1161_v52 = vsel %vm203_vm2, %v1156_v51, 0.0 }
 0xc64   :  { %1162 = vadd.xlane.f32.xlu0 %v1161_v52  ;;  %1230 = vmatpush.msra.mxu0 %v773_v61 }
 0xc66   :  { %1231 = vmatpush.msra.mxu0 %v772_v62 }
 0xc68   :  { %1232 = vmatpush.msra.mxu0 %v771_v63 }
 0xcb7   :  { %v1160_v30 = vpop.xlane.xlu1 %1159 }
 0xcb8   :  { %v1164_v53 = vmul.f32 %v1160_v30, %v1963_v49 }
 0xcba   :  { %v1166_v54 = vsub.f32 %v1153_v48, %v1164_v53  ;;  %v1242_v48 = vperm.slane %v2125_v8, 2 }
 0xcbc   :  { %v1168_v55 = vmul.f32 %v1166_v54, %v1166_v54 }
 0xcbe   :  { %v1170_v56 = vsel %vm203_vm2, %v1168_v55, 0.0 }
 0xcbf   :  { %1171 = vadd.xlane.f32.xlu2 %v1170_v56 }
 0xcd7   :  { %v1163_v57 = vpop.xlane.xlu0 %1162 }
 0xcd8   :  { %v1165_v29 = vmul.f32 %v1163_v57, %v1963_v49 }
 0xcda   :  { %v1167_v58 = vsub.f32 %v1156_v51, %v1165_v29 }
 0xcdc   :  { %v1169_v59 = vmul.f32 %v1167_v58, %v1167_v58 }
 0xcde   :  { %v1173_v60 = vsel %vm203_vm2, %v1169_v59, 0.0 }
 0xcdf   :  { %1174 = vadd.xlane.f32.xlu1 %v1173_v60 }
 0xd32   :  { %v1172_v0 = vpop.xlane.xlu2 %1171 }
 0xd33   :  { %v1176_v1 = vmul.f32 %v1172_v0, %v1963_v49  ;;  %v1327_v0 = vld [vmem:[%s2258_s15 + $0x18] sm:$0xff] }
 0xd34   :  { %1350 = vmatpush.msrb.mxu2 %v1327_v0 }
 0xd35   :  { %v1178_v2 = vadd.f32 1e-06, %v1176_v1  ;;  %v1326_v1 = vld [vmem:[%s2258_s15 + $0x10] sm:$0xff] }
 0xd36   :  { %1351 = vmatpush.msrb.mxu2 %v1326_v1 }
 0xd37   :  { %1647 = vrsqrt.f32 %v1178_v2  ;;  %vm1186_vm4 = vweird.f32 %v1178_v2 }
 0xd3d   :  { %v1648_v3 = vpop.eup %1647 }
 0xd3e   :  { %v1181_v4 = vmul.f32 %v1648_v3, %v1178_v2  ;;  %vm1187_vm3 = vweird.f32 %v1648_v3  ;;  %v1325_v2 = vld [vmem:[%s2258_s15 + $0x8] sm:$0xff] }
 0xd3f   :  { %vm1188_vm7 = vmor %vm1186_vm4, %vm1187_vm3  ;;  %1352 = vmatpush.msrb.mxu2 %v1325_v2 }
 0xd40   :  { %v1182_v5 = vmul.f32 %v1648_v3, %v1181_v4 }
 0xd42   :  { %v1183_v6 = vmul.f32 0.5, %v1182_v5 }
 0xd44   :  { %v1184_v9 = vsub.f32 1.5, %v1183_v6 }
 0xd46   :  { %v1185_v10 = vmul.f32 %v1648_v3, %v1184_v9 }
 0xd48   :  { %v1189_v12 = vsel %vm1188_vm7, %v1648_v3, %v1185_v10  ;;  %v1324_v3 = vld [vmem:[%s2258_s15] sm:$0xff] }
 0xd49   :  { %v1200_v13 = vmul.f32 %v1189_v12, %v1166_v54  ;;  %1353 = vmatpush.msrb.mxu2 %v1324_v3 }
 0xd4b   :  { %v1203_v15 = vmul.f32 %v1202_v11, %v1200_v13 }
 0xd4d   :  { %v1206_v16 = vadd.f32 %v1205_v14, %v1203_v15  ;;  %v1318_v15 = vperm.slane %v2125_v8, 3 }
 0xd4f   :  { %1574 = vmatmul.msk.f32.vlgmr.msra.gmra.mxu0 %vm203_vm2, %v1206_v16 }
 0xd52   :  { %v1175_v20 = vpop.xlane.xlu1 %1174 }
 0xd53   :  { %v1177_v21 = vmul.f32 %v1175_v20, %v1963_v49 }
 0xd55   :  { %v1179_v23 = vadd.f32 1e-06, %v1177_v21 }
 0xd57   :  { %1649 = vrsqrt.f32 %v1179_v23  ;;  %vm1196_vm9 = vweird.f32 %v1179_v23 }
 0xd5d   :  { %v1650_v26 = vpop.eup %1649 }
 0xd5e   :  { %v1191_v27 = vmul.f32 %v1650_v26, %v1179_v23  ;;  %vm1197_vm8 = vweird.f32 %v1650_v26 }
 0xd5f   :  { %vm1198_vm10 = vmor %vm1196_vm9, %vm1197_vm8 }
 0xd60   :  { %v1192_v28 = vmul.f32 %v1650_v26, %v1191_v27 }
 0xd62   :  { %v1193_v31 = vmul.f32 0.5, %v1192_v28 }
 0xd64   :  { %v1194_v32 = vsub.f32 1.5, %v1193_v31 }
 0xd66   :  { %v1195_v33 = vmul.f32 %v1650_v26, %v1194_v32 }
 0xd68   :  { %v1199_v34 = vsel %vm1198_vm10, %v1650_v26, %v1195_v33 }
 0xd69   :  { %v1201_v35 = vmul.f32 %v1199_v34, %v1167_v58 }
 0xd6b   :  { %v1204_v7 = vmul.f32 %v1202_v11, %v1201_v35 }
 0xd6d   :  { %v1207_v36 = vadd.f32 %v1205_v14, %v1204_v7  ;;  %v1659_v7 = vld [vmem:[%s2272_s20] sm:$0xff] }
 0xd6e   :  { %v1363_v40 = vmul.f32 %v1660_v38, %v1659_v7 }
 0xd6f   :  { %1575 = vmatmul.msk.f32.gmra.mxu0 %vm203_vm2, %v1207_v36 }
 0xdcc   :  { %v1234_v42 = vpop.f32.mrf.mxu0 }
 0xdcd   :  { %v1235_v43 = vadd.f32 %v1603_v41, %v1234_v42 }
 0xdcf   :  { %v1240_v44 = vmax.f32 %v1235_v43, 0.0  ;;  %v1391_v43 = vsel %vm99_vm1, %v1659_v7, 0.0 }
 0xdd1   :  { %1576 = vmatmul.msk.f32.vlgmr.msra.gmra.mxu1 %vm668_vm12, %v1240_v44  ;;  %v1661_v44 = vld [vmem:[%s2272_s20 + $0x8] sm:$0xff] }
 0xdec   :  { %v1237_v45 = vpop.f32.mrf.mxu0 }
 0xded   :  { %v1238_v46 = vadd.f32 %v1603_v41, %v1237_v45  ;;  %v1392_v45 = vsel %vm99_vm1, %v1661_v44, 0.0 }
 0xdef   :  { %v1241_v47 = vmax.f32 %v1238_v46, 0.0 }
 0xdf1   :  { %1577 = vmatmul.msk.f32.gmra.mxu1 %vm668_vm12, %v1241_v47  ;;  %v1393_v47 = vadd.f32 %v1392_v45, %v1391_v43 }
 0xe4e   :  { %v1266_v24 = vpop.f32.mrf.mxu1 }
 0xe4f   :  { %v1267_v50 = vadd.f32 %v1266_v24, %v1242_v48 }
 0xe51   :  { %v1272_v51 = vadd.f32 %v1267_v50, %v1206_v16 }
 0xe53   :  { %v1274_v52 = vsel %vm203_vm2, %v1272_v51, 0.0 }
 0xe54   :  { %1275 = vadd.xlane.f32.xlu0 %v1274_v52 }
 0xe6e   :  { %v1269_v30 = vpop.f32.mrf.mxu1 }
 0xe6f   :  { %v1270_v53 = vadd.f32 %v1269_v30, %v1242_v48  ;;  %v1421_v48 = vld [vmem:[%s2273_s3] sm:$0xff]  ;;  %v1422_v30 = vld [vmem:[%s2273_s3 + $0x8] sm:$0xff] }
 0xe71   :  { %v1273_v54 = vadd.f32 %v1270_v53, %v1207_v36  ;;  %v1365_v36 = vsub.f32 1.0, %v1659_v7 }
 0xe73   :  { %v1277_v55 = vsel %vm203_vm2, %v1273_v54, 0.0 }
 0xe74   :  { %1278 = vadd.xlane.f32.xlu1 %v1277_v55 }
 0xec7   :  { %v1276_v56 = vpop.xlane.xlu0 %1275 }
 0xec8   :  { %v1280_v57 = vmul.f32 %v1276_v56, %v1963_v49 }
 0xeca   :  { %v1282_v29 = vsub.f32 %v1272_v51, %v1280_v57  ;;  %v1366_v51 = vsub.f32 1.0, %v1661_v44  ;;  %v1423_v57 = vld [vmem:[%s2274_s28] sm:$0xff] }
 0xecc   :  { %v1284_v58 = vmul.f32 %v1282_v29, %v1282_v29 }
 0xece   :  { %v1286_v59 = vsel %vm203_vm2, %v1284_v58, 0.0 }
 0xecf   :  { %1287 = vadd.xlane.f32.xlu0 %v1286_v59 }
 0xed7   :  { %1394 = vadd.xlane.f32.xlu0 %v1393_v47 }
 0xee7   :  { %v1279_v60 = vpop.xlane.xlu1 %1278 }
 0xee8   :  { %v1281_v39 = vmul.f32 %v1279_v60, %v1963_v49 }
 0xeea   :  { %v1283_v61 = vsub.f32 %v1273_v54, %v1281_v39  ;;  %v1662_v54 = vld [vmem:[%s2271_s29 + $0x8] sm:$0xff] }
 0xeeb   :  { %v1364_v55 = vmul.f32 %v1662_v54, %v1661_v44  ;;  %v1424_v39 = vld [vmem:[%s2274_s28 + $0x8] sm:$0xff] }
 0xeec   :  { %v1285_v62 = vmul.f32 %v1283_v61, %v1283_v61 }
 0xeee   :  { %v1289_v63 = vsel %vm203_vm2, %v1285_v62, 0.0 }
 0xeef   :  { %1290 = vadd.xlane.f32.xlu1 %v1289_v63 }
 0xf42   :  { %v1288_v4 = vpop.xlane.xlu0 %1287 }
 0xf43   :  { %v1292_v5 = vmul.f32 %v1288_v4, %v1963_v49 }
 0xf45   :  { %v1294_v6 = vadd.f32 1e-06, %v1292_v5 }
 0xf47   :  { %1651 = vrsqrt.f32 %v1294_v6  ;;  %vm1302_vm12 = vweird.f32 %v1294_v6 }
 0xf4d   :  { %v1652_v9 = vpop.eup %1651 }
 0xf4e   :  { %v1297_v10 = vmul.f32 %v1652_v9, %v1294_v6  ;;  %vm1303_vm11 = vweird.f32 %v1652_v9 }
 0xf4f   :  { %vm1304_vm13 = vmor %vm1302_vm12, %vm1303_vm11 }
 0xf50   :  { %v1298_v11 = vmul.f32 %v1652_v9, %v1297_v10 }
 0xf52   :  { %v1299_v12 = vmul.f32 0.5, %v1298_v11 }
 0xf54   :  { %v1300_v13 = vsub.f32 1.5, %v1299_v12  ;;  %v1443_v12 = vsel %vm99_vm1, %v1423_v57, 0.0 }
 0xf56   :  { %v1301_v14 = vmul.f32 %v1652_v9, %v1300_v13  ;;  %v1444_v13 = vsel %vm99_vm1, %v1424_v39, 0.0 }
 0xf58   :  { %v1305_v16 = vsel %vm1304_vm13, %v1652_v9, %v1301_v14  ;;  %v1445_v14 = vadd.f32 %v1444_v13, %v1443_v12 }
 0xf59   :  { %v1316_v17 = vmul.f32 %v1305_v16, %v1282_v29 }
 0xf5b   :  { %v1319_v19 = vmul.f32 %v1318_v15, %v1316_v17 }
 0xf5d   :  { %v1322_v20 = vadd.f32 %v1321_v18, %v1319_v19 }
 0xf5f   :  { %1578 = vmatmul.msk.f32.vlgmr.msrb.gmra.mxu2 %vm203_vm2, %v1322_v20 }
 0xf62   :  { %v1291_v21 = vpop.xlane.xlu1 %1290 }
 0xf63   :  { %v1293_v22 = vmul.f32 %v1291_v21, %v1963_v49  ;;  %v1604_v49 = vld [vmem:[%s2259_s16] ss:$0 sm:$0xff]  ;;  %s1486_s16 = sshll.u32 %s2262_s19, 4  ;;  %s1487_s16 = int_to_ptr.hbm [resolvable:$true] %s1486_s16 }
 0xf65   :  { %v1295_v23 = vadd.f32 1e-06, %v1293_v22 }
 0xf67   :  { %1653 = vrsqrt.f32 %v1295_v23  ;;  %vm1312_vm15 = vweird.f32 %v1295_v23 }
 0xf6d   :  { %v1654_v25 = vpop.eup %1653 }
 0xf6e   :  { %v1307_v26 = vmul.f32 %v1654_v25, %v1295_v23  ;;  %vm1313_vm14 = vweird.f32 %v1654_v25 }
 0xf6f   :  { %vm1314_vm0 = vmor %vm1312_vm15, %vm1313_vm14 }
 0xf70   :  { %v1308_v27 = vmul.f32 %v1654_v25, %v1307_v26 }
 0xf72   :  { %v1309_v28 = vmul.f32 0.5, %v1308_v27 }
 0xf74   :  { %v1310_v31 = vsub.f32 1.5, %v1309_v28 }
 0xf76   :  { %v1311_v32 = vmul.f32 %v1654_v25, %v1310_v31 }
 0xf78   :  { %v1315_v33 = vsel %vm1314_vm0, %v1654_v25, %v1311_v32 }
 0xf79   :  { %v1317_v8 = vmul.f32 %v1315_v33, %v1283_v61 }
 0xf7b   :  { %v1320_v34 = vmul.f32 %v1318_v15, %v1317_v8  ;;  %v1395_v15 = vpop.xlane.xlu0 %1394 }
 0xf7c   :  { %v1396_v16 = vrot.slane %v1395_v15, 4 }
 0xf7d   :  { %v1323_v35 = vadd.f32 %v1321_v18, %v1320_v34 }
 0xf7e   :  { %v1397_v17 = vadd.f32 %v1396_v16, %v1395_v15 }
 0xf7f   :  { %1579 = vmatmul.msk.f32.gmra.mxu2 %vm203_vm2, %v1323_v35 }
 0xf80   :  { %v1398_v18 = vrot.slane %v1397_v17, 2 }
 0xf82   :  { %v1399_v22 = vadd.f32 %v1398_v18, %v1397_v17 }
 0xf84   :  { %v1400_v26 = vrot.slane %v1399_v22, 1 }
 0xf86   :  { %v1401_v31 = vadd.f32 %v1400_v26, %v1399_v22 }
 0xfe2   :  { %v1355_v37 = vpop.f32.mrf.mxu2 }
 0xfe3   :  { %v1356_v41 = vadd.f32 %v1604_v49, %v1355_v37 }
 0xfe5   :  { %1361 = vst.msk [vmem:[%s2261_s18] sm:$0xff] %vm99_vm1, %v1356_v41  ;;  %v1367_v42 = vmul.f32 %v1365_v36, %v1356_v41  ;;  %v1425_v24 = vsub.f32 %v1356_v41, %v1421_v48  ;;  %v1373_v50 = vsub.f32 %v1356_v41, %v1660_v38 }
 0xfe7   :  { %v1369_v46 = vadd.f32 %v1367_v42, %v1363_v40  ;;  %v1427_v53 = vand.u32 2147483647, %v1425_v24  ;;  %v1375_v29 = vand.u32 2147483647, %v1373_v50 }
 0xfe9   :  { %1371 = vst.msk [vmem:[%s2260_s17] sm:$0xff] %vm99_vm1, %v1369_v46  ;;  %v1429_v61 = vmul.f32 %v1427_v53, %v1423_v57  ;;  %v1377_v1 = vmul.f32 %v1659_v7, %v1375_v29 }
 0xfeb   :  { %v1431_v4 = vsel %vm99_vm1, %v1429_v61, 0.0  ;;  %v1379_v6 = vsel %vm99_vm1, %v1377_v1, 0.0 }
0x1002   :  { %v1358_v52 = vpop.f32.mrf.mxu2 }
0x1003   :  { %v1359_v56 = vadd.f32 %v1604_v49, %v1358_v52 }
0x1005   :  { %1362 = vst.msk [vmem:[%s2261_s18 + $0x8] sm:$0xff] %vm99_vm1, %v1359_v56  ;;  %v1368_v58 = vmul.f32 %v1366_v51, %v1359_v56  ;;  %v1426_v59 = vsub.f32 %v1359_v56, %v1422_v30  ;;  %v1374_v60 = vsub.f32 %v1359_v56, %v1662_v54 }
0x1007   :  { %v1370_v62 = vadd.f32 %v1368_v58, %v1364_v55  ;;  %v1428_v63 = vand.u32 2147483647, %v1426_v59  ;;  %v1376_v0 = vand.u32 2147483647, %v1374_v60 }
0x1009   :  { %1372 = vst.msk [vmem:[%s2260_s17 + $0x8] sm:$0xff] %vm99_vm1, %v1370_v62  ;;  %v1430_v2 = vmul.f32 %v1428_v63, %v1424_v39  ;;  %v1378_v3 = vmul.f32 %v1661_v44, %v1376_v0 }
0x100b   :  { %v1432_v5 = vsel %vm99_vm1, %v1430_v2, 0.0  ;;  %v1380_v9 = vsel %vm99_vm1, %v1378_v3, 0.0 }
0x100c   :  { %v1433_v10 = vadd.f32 %v1432_v5, %v1431_v4  ;;  %v1381_v11 = vadd.f32 %v1380_v9, %v1379_v6 }
0x100e   :  { %1434 = vadd.xlane.f32.xlu1 %v1433_v10  ;;  %1382 = vadd.xlane.f32.xlu2 %v1381_v11 }
0x1016   :  { %1446 = vadd.xlane.f32.xlu2 %v1445_v14 }
0x1081   :  { %v1383_v19 = vpop.xlane.xlu2 %1382  ;;  %v1435_v32 = vpop.xlane.xlu1 %1434 }
0x1082   :  { %v1384_v20 = vrot.slane %v1383_v19, 4  ;;  %v1436_v8 = vrot.slane %v1435_v32, 4 }
0x1084   :  { %v1385_v21 = vadd.f32 %v1384_v20, %v1383_v19  ;;  %v1437_v49 = vadd.f32 %v1436_v8, %v1435_v32 }
0x1086   :  { %v1386_v23 = vrot.slane %v1385_v21, 2  ;;  %v1438_v36 = vrot.slane %v1437_v49, 2 }
0x1088   :  { %v1387_v25 = vadd.f32 %v1386_v23, %v1385_v21  ;;  %v1439_v41 = vadd.f32 %v1438_v36, %v1437_v49 }
0x1089   :  { %v1447_v33 = vpop.xlane.xlu2 %1446 }
0x108a   :  { %v1388_v27 = vrot.slane %v1387_v25, 1  ;;  %v1448_v34 = vrot.slane %v1447_v33, 4  ;;  %v1440_v47 = vrot.slane %v1439_v41, 1 }
0x108c   :  { %v1389_v28 = vadd.f32 %v1388_v27, %v1387_v25  ;;  %v1449_v7 = vadd.f32 %v1448_v34, %v1447_v33  ;;  %v1441_v30 = vadd.f32 %v1440_v47, %v1439_v41 }
0x108e   :  { %1581 = vpush %v1389_v28  ;;  %v1450_v37 = vrot.slane %v1449_v7, 2 }
0x108f   :  { %1583 = vpush %v1401_v31 }
0x1090   :  { %v1451_v43 = vadd.f32 %v1450_v37, %v1449_v7 }
0x1092   :  { %v1452_v24 = vrot.slane %v1451_v43, 1 }
0x1094   :  { %v1453_v53 = vadd.f32 %v1452_v24, %v1451_v43 }
0x10bf   :  { %s2237_s17 = spop %1581 }
0x10c0   :  { %s1584_s18 = spop %1583 }
0x10c1   :  { %s1403_s15 = sadd.f32 1e-12, %s1584_s18 }
0x10c3   :  { %v1404_v35 = vstv %s1403_s15 }
0x10c4   :  { %1655 = vrcp.f32 %v1404_v35  ;;  %v1416_v44 = vand.u32 2147483648, %v1404_v35  ;;  %v1414_v46 = vand.u32 2147483647, %v1404_v35  ;;  %vm1410_vm2 = vweird.f32 %v1404_v35 }
0x10c6   :  { %v1417_v50 = vor.u32 1.1754944e-38, %v1416_v44  ;;  %vm1415_vm6 = vcmp.eq.f32.partialorder %v1414_v46, 8.507059e+37 }
0x10ca   :  { %v1656_v38 = vpop.eup %1655 }
0x10cb   :  { %v1406_v40 = vmul.f32 %v1656_v38, %v1404_v35  ;;  %vm1411_vm1 = vweird.f32 %v1656_v38 }
0x10cc   :  { %vm1412_vm5 = vmor %vm1410_vm2, %vm1411_vm1 }
0x10cd   :  { %v1407_v42 = vsub.f32 1.0, %v1406_v40 }
0x10cf   :  { %v1408_v45 = vmul.f32 %v1656_v38, %v1407_v42 }
0x10d1   :  { %v1409_v48 = vadd.f32 %v1656_v38, %v1408_v45 }
0x10d3   :  { %v1413_v51 = vsel %vm1412_vm5, %v1656_v38, %v1409_v48 }
0x10d4   :  { %v1418_v52 = vsel %vm1415_vm6, %v1417_v50, %v1413_v51 }
0x10d5   :  { %1585 = vpush %v1418_v52 }
0x10d6   :  { %1587 = vpush %v1441_v30 }
0x10d7   :  { %1589 = vpush %v1453_v53 }
0x1106   :  { %s1586_s14 = spop %1585 }
0x1107   :  { %s1420_s1 = smul.f32 %s1586_s14, %s2237_s17  ;;  %s1588_s0 = spop %1587 }
0x1108   :  { %s1590_s30 = spop %1589 }
0x1109   :  { %1474 = sst [smem:[#allocation7]] %s1420_s1 }
0x110a   :  { %s1455_s5 = sadd.f32 1e-12, %s1590_s30 }
0x110c   :  { %v1456_v54 = vstv %s1455_s5 }
0x110d   :  { %1657 = vrcp.f32 %v1456_v54  ;;  %v1468_v29 = vand.u32 2147483648, %v1456_v54  ;;  %v1466_v59 = vand.u32 2147483647, %v1456_v54  ;;  %vm1462_vm4 = vweird.f32 %v1456_v54 }
0x110f   :  { %v1469_v39 = vor.u32 1.1754944e-38, %v1468_v29  ;;  %vm1467_vm8 = vcmp.eq.f32.partialorder %v1466_v59, 8.507059e+37 }
0x1113   :  { %v1658_v55 = vpop.eup %1657 }
0x1114   :  { %v1458_v56 = vmul.f32 %v1658_v55, %v1456_v54  ;;  %vm1463_vm3 = vweird.f32 %v1658_v55 }
0x1115   :  { %vm1464_vm7 = vmor %vm1462_vm4, %vm1463_vm3 }
0x1116   :  { %v1459_v57 = vsub.f32 1.0, %v1458_v56 }
0x1118   :  { %v1460_v58 = vmul.f32 %v1658_v55, %v1459_v57 }
0x111a   :  { %v1461_v60 = vadd.f32 %v1658_v55, %v1460_v58 }
0x111c   :  { %v1465_v61 = vsel %vm1464_vm7, %v1658_v55, %v1461_v60 }
0x111d   :  { %v1470_v62 = vsel %vm1467_vm8, %v1469_v39, %v1465_v61 }
0x111e   :  { %1591 = vpush %v1470_v62 }
0x114f   :  { %s1592_s22 = spop %1591 }
0x1150   :  { %s1472_s2 = smul.f32 %s1592_s22, %s1588_s0 }
0x1152   :  { %1476 = sst [smem:[#allocation7 + $0x1]] %s1472_s2 }
0x1153   :  { %1489 = dma.smem_to_hbm %s1736_s23, 16, %s1487_s16, [#allocation4]  }
0x1154   :  { %1727 = dma.done.wait [#allocation4], 16  }
0x1155   :  { %1728 = vsyncadd [#allocation4], 4294967280 }
0x1156   :  { %1498 = sfence }
0x1157   :  { %1499 = vsyncpa [#allocation3], 1 }
0x1158   :  { %1500 = vsyncpa [#allocation6], 1 }
0x1159   :  { %1501 = vsyncpa [#allocation4], 1 }

</bundles_post_ra>
